<compile_context>
chip_gen: v5e
topology: v5e:2x2
jax: 0.10.0
libtpu: 0.0.40
codegen_flags: <defaults>
</compile_context>

<pallas_src>
import functools

import jax
import jax.numpy as jnp
from jax.experimental import pallas as pl
from jax.experimental.pallas import tpu as pltpu


def _cdiv(a, b):
    return (a + b - 1) // b


def _round_up(x, m):
    return ((x + m - 1) // m) * m


def _vmem_budget():
    """Generation-aware VMEM sizing: (tile budget, vmem_limit_bytes, max thw).

    v5e/v6e have 128 MiB physical VMEM -> large tiles; v7x has 64 MiB physical
    (32 MiB scoped default) -> keep the conservative numbers.
    """
    phys = 64 * 1024 * 1024
    try:
        phys = int(getattr(pltpu.get_tpu_info(), "vmem_capacity_bytes", phys))
    except Exception:
        pass
    if phys >= 96 * 1024 * 1024:                      # v5e / v6e
        return 48 * 1024 * 1024, 64 * 1024 * 1024, 4096
    return 24 * 1024 * 1024, 32 * 1024 * 1024, 2048   # v7x


def _pick_hw_tile(bs, hw, cin, cout, itemsize, budget, cap, min_grid_blocks=2):
    """Pick the HW (lane) tile size.

    Prefer one exact-hw tile (no ragged masking, legal because the block dim
    then equals the full array dim).  Otherwise take the largest 128-multiple
    that fits the VMEM budget; the ragged tail is handled by the cdiv grid.
    Also try to expose >=2 grid blocks so both v7x TensorCores get work
    (costs at most one extra ~0.35us step on 1-TC chips).
    """

    def footprint(t):
        # double-buffered streaming in/out tiles + f32 intermediates
        # + resident (single-buffered) weights/bias
        return (2 * t * cin * itemsize + 2 * t * cout * itemsize
                + 2 * t * cout * 4 + cout * cin * itemsize + cout * 4)

    if hw <= 128 and footprint(hw) <= budget:
        return hw                                      # cannot usefully split further
    if hw <= cap and footprint(hw) <= budget and bs >= min_grid_blocks:
        return hw                                      # exact tile, no masking needed
    thw = min(_round_up(hw, 128), cap)
    while thw > 128 and footprint(thw) > budget:
        thw -= 128
    while thw > 128 and bs * _cdiv(hw, thw) < min_grid_blocks:
        thw = _round_up(max(thw // 2, 128), 128)       # strictly decreasing, >=128
    return thw


def _conv1x1_kernel(x_ref, w_ref, b_ref, o_ref, *, na):
    # x_ref: (1, cin, thw)      input tile, HW on lanes (NCHW is channel-major)
    # w_ref: (na, no, cin)      resident weights
    # b_ref: (na, 1, no)  f32   resident bias (kept f32 for parity with PyTorch)
    # o_ref: (1, na, thw, no)   output tile already in the permuted layout
    x = x_ref[0]                                        # (cin, thw)
    for a in range(na):                                 # static unroll; na is tiny (3)
        acc = jnp.dot(w_ref[a], x,
                      preferred_element_type=jnp.float32)   # MXU: (no, thw) f32
        y = acc.T + b_ref[a]                            # XLU transpose -> (thw, no), f32 bias add
        o_ref[0, a] = y.astype(o_ref.dtype)


# Flipped off (once) if this Pallas build rejects single-buffered constants.
_SINGLE_BUFFER_CONSTS_OK = True


def conv1x1_nchw_pallas(x, w3, b3, *, max_thw=None):
    """Fused 1x1 conv + (0,1,3,4,2) permute on NCHW data.

    x:   (bs, cin, H, W)
    w3:  (na, no, cin)     -- PyTorch Conv2d weight reshaped (cout = na*no)
    b3:  (na, 1, no) f32   -- PyTorch Conv2d bias reshaped
    returns: (bs, na, H*W, no)   (reshape to (bs, na, H, W, no) is free)
    """
    global _SINGLE_BUFFER_CONSTS_OK

    bs, cin, H, W = x.shape
    na, no, _ = w3.shape
    cout = na * no
    hw = H * W
    itemsize = jnp.dtype(x.dtype).itemsize

    budget, vmem_limit, cap = _vmem_budget()
    if max_thw is not None:
        cap = min(cap, max_thw)
    thw = _pick_hw_tile(bs, hw, cin, cout, itemsize, budget, cap)
    n_hw = _cdiv(hw, thw)

    xr = x.reshape(bs, cin, hw)          # free: NCHW is already channel-major

    kernel = functools.partial(_conv1x1_kernel, na=na)
    cost = pl.CostEstimate(
        flops=2 * bs * hw * cin * cout,
        transcendentals=0,
        bytes_accessed=(bs * hw * (cin + cout) * itemsize
                        + cout * cin * itemsize + cout * 4),
    )

    def build(single_buffer_consts):
        const_kw = {"pipeline_mode": pl.Buffered(1)} if single_buffer_consts else {}
        return pl.pallas_call(
            kernel,
            out_shape=jax.ShapeDtypeStruct((bs, na, hw, no), x.dtype),
            grid_spec=pltpu.PrefetchScalarGridSpec(
                num_scalar_prefetch=0,
                grid=(bs, n_hw),
                in_specs=[
                    pl.BlockSpec((1, cin, thw), lambda bi, j: (bi, 0, j)),
                    pl.BlockSpec((na, no, cin), lambda bi, j: (0, 0, 0), **const_kw),
                    pl.BlockSpec((na, 1, no), lambda bi, j: (0, 0, 0), **const_kw),
                ],
                out_specs=pl.BlockSpec((1, na, thw, no),
                                       lambda bi, j: (bi, 0, j, 0)),
            ),
            compiler_params=pltpu.CompilerParams(
                dimension_semantics=("parallel", "parallel"),
                vmem_limit_bytes=vmem_limit,
            ),
            cost_estimate=cost,
        )

    if _SINGLE_BUFFER_CONSTS_OK:
        try:
            return build(True)(xr, w3, b3)
        except Exception:
            # This Pallas build does not accept pl.Buffered(1) on pallas_call
            # BlockSpecs; fall back to default double-buffered constants.
            _SINGLE_BUFFER_CONSTS_OK = False
    return build(False)(xr, w3, b3)


class DetectPallas:
    """JAX/Pallas port of the PyTorch Detect module (training-mode forward)."""

    def __init__(self, nc, anchors=(), ch=(), n_degree=90, key=None,
                 compute_dtype=jnp.float32):
        self.nc = nc
        self.n_degree = n_degree
        self.no = 5 + nc + n_degree
        self.nl = len(anchors)
        self.na = len(anchors[0]) // 2
        a = jnp.asarray(anchors, dtype=jnp.float32).reshape(self.nl, -1, 2)
        self.anchors = a                                   # unused in training forward
        self.anchor_grid = a.reshape(self.nl, 1, -1, 1, 1, 2)
        # compute_dtype=jnp.bfloat16 halves input/output HBM traffic on the
        # memory-bound big levels (f32 MXU accumulation + f32 bias are kept
        # inside the kernel).  Default f32 matches the PyTorch reference.
        self.compute_dtype = compute_dtype

        if key is None:
            key = jax.random.PRNGKey(0)
        cout = self.no * self.na
        self.weights = []  # each: (Cout, Cin) == PyTorch conv weight[:, :, 0, 0]
        self.biases = []   # each: (Cout,)
        for cin in ch:
            key, kw, kb = jax.random.split(key, 3)
            bound = 1.0 / (cin ** 0.5)
            w = jax.random.uniform(kw, (cout, cin), jnp.float32, -bound, bound)
            b = jax.random.uniform(kb, (cout,), jnp.float32, -bound, bound)
            self.weights.append(w)
            self.biases.append(b)

    def __call__(self, xs):
        """xs: list of nl arrays in NCHW layout (bs, ch[i], ny, nx).

        Returns list of arrays of shape (bs, na, ny, nx, no), matching
        PyTorch's view(bs, na, no, ny, nx).permute(0, 1, 3, 4, 2).
        """
        outs = []
        for i in range(self.nl):
            x = xs[i]
            bs, cin, ny, nx = x.shape
            w, b = self.weights[i], self.biases[i]
            if self.compute_dtype != jnp.float32:
                x = x.astype(self.compute_dtype)
                w = w.astype(self.compute_dtype)
            w3 = w.reshape(self.na, self.no, cin)          # channel c = a*no + o
            b3 = b.astype(jnp.float32).reshape(self.na, 1, self.no)
            y = conv1x1_nchw_pallas(x, w3, b3)             # (bs, na, ny*nx, no)
            outs.append(y.reshape(bs, self.na, ny, nx, self.no))  # free reshape
        return outs


if __name__ == "__main__":
    # Small, deterministic example consistent with the module:
    # 3 levels (YOLOv5-style anchors -> na=3), nc=3 classes, n_degree=8
    # -> no = 5 + 3 + 8 = 16, Cout = na*no = 48.
    nc = 3
    n_degree = 8
    anchors = (
        (10, 13, 16, 30, 33, 23),
        (30, 61, 62, 45, 59, 119),
        (116, 90, 156, 198, 373, 326),
    )
    ch = (16, 32, 64)
    spatial = (16, 8, 4)
    bs = 2

    key = jax.random.PRNGKey(0)
    detect = DetectPallas(nc, anchors=anchors, ch=ch, n_degree=n_degree, key=key)

    xs = []
    for cin, s in zip(ch, spatial):
        key, kx = jax.random.split(key)
        xs.append(jax.random.normal(kx, (bs, cin, s, s), dtype=jnp.float32))

    outs = jax.block_until_ready(detect(xs))

    # Sanity-check shapes and values against a plain-JAX reference of
    # conv1x1 + view + permute.
    na, no = detect.na, detect.no
    for i, (cin, s) in enumerate(zip(ch, spatial)):
        assert outs[i].shape == (bs, na, s, s, no), outs[i].shape
        x_flat = jnp.transpose(xs[i], (0, 2, 3, 1)).reshape(bs * s * s, cin)
        ref = x_flat @ detect.weights[i].T + detect.biases[i]
        ref = ref.reshape(bs, s, s, na, no)
        ref = jnp.transpose(ref, (0, 3, 1, 2, 4))
        err = float(jnp.max(jnp.abs(outs[i] - ref)))
        assert jnp.allclose(outs[i], ref, atol=1e-4, rtol=1e-4), err

    # Extra check: ragged HW tail (hw=400 is not a 128-multiple) handled by the
    # cdiv grid with masked OOB writes (forced 128-lane tiles -> 4 blocks,
    # the last one covering only 16 valid columns).
    key, kx = jax.random.split(key)
    x_rag = jax.random.normal(kx, (1, ch[0], 20, 20), dtype=jnp.float32)
    w3 = detect.weights[0].reshape(na, no, ch[0])
    b3 = detect.biases[0].astype(jnp.float32).reshape(na, 1, no)
    y_rag = jax.block_until_ready(conv1x1_nchw_pallas(x_rag, w3, b3, max_thw=128))
    assert y_rag.shape == (1, na, 400, no), y_rag.shape
    xf = jnp.transpose(x_rag, (0, 2, 3, 1)).reshape(400, ch[0])
    ref_rag = (xf @ detect.weights[0].T + detect.biases[0]).reshape(400, na, no)
    ref_rag = jnp.transpose(ref_rag, (1, 0, 2))[None]
    err = float(jnp.max(jnp.abs(y_rag - ref_rag)))
    assert jnp.allclose(y_rag, ref_rag, atol=1e-4, rtol=1e-4), err

    print("KERNEL_OK")
</pallas_src>

<mosaic_0001>
module attributes {stable_mosaic.version = 11 : i64} {
  func.func @_conv1x1_kernel(%arg0: i32, %arg1: i32, %arg2: memref<1x16x256xf32, #tpu.memory_space<vmem>>, %arg3: memref<3x16x16xf32, #tpu.memory_space<vmem>>, %arg4: memref<3x1x16xf32, #tpu.memory_space<vmem>>, %arg5: memref<1x3x256x16xf32, #tpu.memory_space<vmem>>) attributes {dimension_semantics = [#tpu.dimension_semantics<parallel>, #tpu.dimension_semantics<parallel>], iteration_bounds = array<i64: 2, 1>, scalar_prefetch = 0 : i64, scratch_operands = 0 : i64, tpu.core_type = #tpu.core_type<tc>, window_params = [{transform_indices = @transform_0, window_bounds = array<i64: 1, 16, 256>}, {pipeline_mode = #tpu.pipeline_mode<synchronous>, transform_indices = @transform_1, window_bounds = array<i64: 3, 16, 16>}, {pipeline_mode = #tpu.pipeline_mode<synchronous>, transform_indices = @transform_2, window_bounds = array<i64: 3, 1, 16>}, {transform_indices = @transform_3, window_bounds = array<i64: 1, 3, 256, 16>}]} {
    %c0 = arith.constant 0 : index
    %c0_0 = arith.constant 0 : index
    %c0_1 = arith.constant 0 : index
    %0 = vector.load %arg2[%c0, %c0_0, %c0_1] : memref<1x16x256xf32, #tpu.memory_space<vmem>>, vector<1x16x256xf32>
    %1 = vector.shape_cast %0 : vector<1x16x256xf32> to vector<16x256xf32>
    %c0_2 = arith.constant 0 : index
    %c0_3 = arith.constant 0 : index
    %c0_4 = arith.constant 0 : index
    %2 = vector.load %arg3[%c0_2, %c0_3, %c0_4] : memref<3x16x16xf32, #tpu.memory_space<vmem>>, vector<1x16x16xf32>
    %3 = vector.shape_cast %2 : vector<1x16x16xf32> to vector<16x16xf32>
    %cst = arith.constant dense<0.000000e+00> : vector<16x256xf32>
    %4 = tpu.matmul %3, %1, %cst {dimension_numbers = #tpu.dot_dimension_numbers<[1], [0], [0], [1], [0, 0, 1, 1], [], []>} : vector<16x16xf32>, vector<16x256xf32>, vector<16x256xf32> -> vector<16x256xf32>
    %5 = tpu.transpose %4, [1, 0] : vector<16x256xf32> -> vector<256x16xf32>
    %c0_5 = arith.constant 0 : index
    %c0_6 = arith.constant 0 : index
    %c0_7 = arith.constant 0 : index
    %6 = vector.load %arg4[%c0_5, %c0_6, %c0_7] : memref<3x1x16xf32, #tpu.memory_space<vmem>>, vector<1x1x16xf32>
    %7 = vector.shape_cast %6 : vector<1x1x16xf32> to vector<1x16xf32>
    %8 = vector.broadcast %7 : vector<1x16xf32> to vector<256x16xf32>
    %9 = arith.addf %5, %8 : vector<256x16xf32>
    %c0_8 = arith.constant 0 : index
    %c0_9 = arith.constant 0 : index
    %c0_10 = arith.constant 0 : index
    %c0_11 = arith.constant 0 : index
    %10 = vector.load %arg5[%c0_8, %c0_9, %c0_10, %c0_11] : memref<1x3x256x16xf32, #tpu.memory_space<vmem>>, vector<1x1x256x16xf32>
    %11 = vector.shape_cast %10 : vector<1x1x256x16xf32> to vector<256x16xf32>
    %12 = vector.shape_cast %9 : vector<256x16xf32> to vector<1x1x256x16xf32>
    tpu.vector_store %arg5[%c0_8, %c0_9, %c0_10, %c0_11], %12 {strides = array<i32>} : memref<1x3x256x16xf32, #tpu.memory_space<vmem>>, vector<1x1x256x16xf32>,
    %c1 = arith.constant 1 : index
    %c0_12 = arith.constant 0 : index
    %c0_13 = arith.constant 0 : index
    %13 = vector.load %arg3[%c1, %c0_12, %c0_13] : memref<3x16x16xf32, #tpu.memory_space<vmem>>, vector<1x16x16xf32>
    %14 = vector.shape_cast %13 : vector<1x16x16xf32> to vector<16x16xf32>
    %cst_14 = arith.constant dense<0.000000e+00> : vector<16x256xf32>
    %15 = tpu.matmul %14, %1, %cst_14 {dimension_numbers = #tpu.dot_dimension_numbers<[1], [0], [0], [1], [0, 0, 1, 1], [], []>} : vector<16x16xf32>, vector<16x256xf32>, vector<16x256xf32> -> vector<16x256xf32>
    %16 = tpu.transpose %15, [1, 0] : vector<16x256xf32> -> vector<256x16xf32>
    %c1_15 = arith.constant 1 : index
    %c0_16 = arith.constant 0 : index
    %c0_17 = arith.constant 0 : index
    %17 = vector.load %arg4[%c1_15, %c0_16, %c0_17] : memref<3x1x16xf32, #tpu.memory_space<vmem>>, vector<1x1x16xf32>
    %18 = vector.shape_cast %17 : vector<1x1x16xf32> to vector<1x16xf32>
    %19 = vector.broadcast %18 : vector<1x16xf32> to vector<256x16xf32>
    %20 = arith.addf %16, %19 : vector<256x16xf32>
    %c0_18 = arith.constant 0 : index
    %c1_19 = arith.constant 1 : index
    %c0_20 = arith.constant 0 : index
    %c0_21 = arith.constant 0 : index
    %21 = vector.load %arg5[%c0_18, %c1_19, %c0_20, %c0_21] : memref<1x3x256x16xf32, #tpu.memory_space<vmem>>, vector<1x1x256x16xf32>
    %22 = vector.shape_cast %21 : vector<1x1x256x16xf32> to vector<256x16xf32>
    %23 = vector.shape_cast %20 : vector<256x16xf32> to vector<1x1x256x16xf32>
    tpu.vector_store %arg5[%c0_18, %c1_19, %c0_20, %c0_21], %23 {strides = array<i32>} : memref<1x3x256x16xf32, #tpu.memory_space<vmem>>, vector<1x1x256x16xf32>,
    %c2 = arith.constant 2 : index
    %c0_22 = arith.constant 0 : index
    %c0_23 = arith.constant 0 : index
    %24 = vector.load %arg3[%c2, %c0_22, %c0_23] : memref<3x16x16xf32, #tpu.memory_space<vmem>>, vector<1x16x16xf32>
    %25 = vector.shape_cast %24 : vector<1x16x16xf32> to vector<16x16xf32>
    %cst_24 = arith.constant dense<0.000000e+00> : vector<16x256xf32>
    %26 = tpu.matmul %25, %1, %cst_24 {dimension_numbers = #tpu.dot_dimension_numbers<[1], [0], [0], [1], [0, 0, 1, 1], [], []>} : vector<16x16xf32>, vector<16x256xf32>, vector<16x256xf32> -> vector<16x256xf32>
    %27 = tpu.transpose %26, [1, 0] : vector<16x256xf32> -> vector<256x16xf32>
    %c2_25 = arith.constant 2 : index
    %c0_26 = arith.constant 0 : index
    %c0_27 = arith.constant 0 : index
    %28 = vector.load %arg4[%c2_25, %c0_26, %c0_27] : memref<3x1x16xf32, #tpu.memory_space<vmem>>, vector<1x1x16xf32>
    %29 = vector.shape_cast %28 : vector<1x1x16xf32> to vector<1x16xf32>
    %30 = vector.broadcast %29 : vector<1x16xf32> to vector<256x16xf32>
    %31 = arith.addf %27, %30 : vector<256x16xf32>
    %c0_28 = arith.constant 0 : index
    %c2_29 = arith.constant 2 : index
    %c0_30 = arith.constant 0 : index
    %c0_31 = arith.constant 0 : index
    %32 = vector.load %arg5[%c0_28, %c2_29, %c0_30, %c0_31] : memref<1x3x256x16xf32, #tpu.memory_space<vmem>>, vector<1x1x256x16xf32>
    %33 = vector.shape_cast %32 : vector<1x1x256x16xf32> to vector<256x16xf32>
    %34 = vector.shape_cast %31 : vector<256x16xf32> to vector<1x1x256x16xf32>
    tpu.vector_store %arg5[%c0_28, %c2_29, %c0_30, %c0_31], %34 {strides = array<i32>} : memref<1x3x256x16xf32, #tpu.memory_space<vmem>>, vector<1x1x256x16xf32>,
    return
  }
  func.func @transform_0(%arg0: i32, %arg1: i32) -> (i32, i32, i32) {
    %c0_i32 = arith.constant 0 : i32
    %c0_i32_0 = arith.constant 0 : i32
    return %arg0, %c0_i32, %arg1 : i32, i32, i32
  }
  func.func @transform_1(%arg0: i32, %arg1: i32) -> (i32, i32, i32) {
    %c0_i32 = arith.constant 0 : i32
    %c0_i32_0 = arith.constant 0 : i32
    %c0_i32_1 = arith.constant 0 : i32
    %c0_i32_2 = arith.constant 0 : i32
    return %c0_i32, %c0_i32_0, %c0_i32_1 : i32, i32, i32
  }
  func.func @transform_2(%arg0: i32, %arg1: i32) -> (i32, i32, i32) {
    %c0_i32 = arith.constant 0 : i32
    %c0_i32_0 = arith.constant 0 : i32
    %c0_i32_1 = arith.constant 0 : i32
    %c0_i32_2 = arith.constant 0 : i32
    return %c0_i32, %c0_i32_0, %c0_i32_1 : i32, i32, i32
  }
  func.func @transform_3(%arg0: i32, %arg1: i32) -> (i32, i32, i32, i32) {
    %c0_i32 = arith.constant 0 : i32
    %c0_i32_0 = arith.constant 0 : i32
    %c0_i32_1 = arith.constant 0 : i32
    return %arg0, %c0_i32, %arg1, %c0_i32_0 : i32, i32, i32, i32
  }
}

module attributes {stable_mosaic.version = 11 : i64} {
  func.func @_conv1x1_kernel(%arg0: i32, %arg1: i32, %arg2: memref<1x16x256xf32, #tpu.memory_space<vmem>>, %arg3: memref<3x16x16xf32, #tpu.memory_space<vmem>>, %arg4: memref<3x1x16xf32, #tpu.memory_space<vmem>>, %arg5: memref<1x3x256x16xf32, #tpu.memory_space<vmem>>) attributes {dimension_semantics = [#tpu.dimension_semantics<parallel>, #tpu.dimension_semantics<parallel>], iteration_bounds = array<i64: 2, 1>, scalar_prefetch = 0 : i64, scratch_operands = 0 : i64, tpu.core_type = #tpu.core_type<tc>, window_params = [{transform_indices = @transform_0, window_bounds = array<i64: 1, 16, 256>}, {pipeline_mode = #tpu.pipeline_mode<synchronous>, transform_indices = @transform_1, window_bounds = array<i64: 3, 16, 16>}, {pipeline_mode = #tpu.pipeline_mode<synchronous>, transform_indices = @transform_2, window_bounds = array<i64: 3, 1, 16>}, {transform_indices = @transform_3, window_bounds = array<i64: 1, 3, 256, 16>}]} {
    %c0 = arith.constant 0 : index
    %c0_0 = arith.constant 0 : index
    %c0_1 = arith.constant 0 : index
    %0 = vector.load %arg2[%c0, %c0_0, %c0_1] : memref<1x16x256xf32, #tpu.memory_space<vmem>>, vector<1x16x256xf32>
    %1 = vector.shape_cast %0 : vector<1x16x256xf32> to vector<16x256xf32>
    %c0_2 = arith.constant 0 : index
    %c0_3 = arith.constant 0 : index
    %c0_4 = arith.constant 0 : index
    %2 = vector.load %arg3[%c0_2, %c0_3, %c0_4] : memref<3x16x16xf32, #tpu.memory_space<vmem>>, vector<1x16x16xf32>
    %3 = vector.shape_cast %2 : vector<1x16x16xf32> to vector<16x16xf32>
    %cst = arith.constant dense<0.000000e+00> : vector<16x256xf32>
    %4 = tpu.matmul %3, %1, %cst {dimension_numbers = #tpu.dot_dimension_numbers<[1], [0], [0], [1], [0, 0, 1, 1], [], []>} : vector<16x16xf32>, vector<16x256xf32>, vector<16x256xf32> -> vector<16x256xf32>
    %5 = tpu.transpose %4, [1, 0] : vector<16x256xf32> -> vector<256x16xf32>
    %c0_5 = arith.constant 0 : index
    %c0_6 = arith.constant 0 : index
    %c0_7 = arith.constant 0 : index
    %6 = vector.load %arg4[%c0_5, %c0_6, %c0_7] : memref<3x1x16xf32, #tpu.memory_space<vmem>>, vector<1x1x16xf32>
    %7 = vector.shape_cast %6 : vector<1x1x16xf32> to vector<1x16xf32>
    %8 = vector.broadcast %7 : vector<1x16xf32> to vector<256x16xf32>
    %9 = arith.addf %5, %8 : vector<256x16xf32>
    %c0_8 = arith.constant 0 : index
    %c0_9 = arith.constant 0 : index
    %c0_10 = arith.constant 0 : index
    %c0_11 = arith.constant 0 : index
    %10 = vector.load %arg5[%c0_8, %c0_9, %c0_10, %c0_11] : memref<1x3x256x16xf32, #tpu.memory_space<vmem>>, vector<1x1x256x16xf32>
    %11 = vector.shape_cast %10 : vector<1x1x256x16xf32> to vector<256x16xf32>
    %12 = vector.shape_cast %9 : vector<256x16xf32> to vector<1x1x256x16xf32>
    tpu.vector_store %arg5[%c0_8, %c0_9, %c0_10, %c0_11], %12 {strides = array<i32>} : memref<1x3x256x16xf32, #tpu.memory_space<vmem>>, vector<1x1x256x16xf32>,
    %c1 = arith.constant 1 : index
    %c0_12 = arith.constant 0 : index
    %c0_13 = arith.constant 0 : index
    %13 = vector.load %arg3[%c1, %c0_12, %c0_13] : memref<3x16x16xf32, #tpu.memory_space<vmem>>, vector<1x16x16xf32>
    %14 = vector.shape_cast %13 : vector<1x16x16xf32> to vector<16x16xf32>
    %cst_14 = arith.constant dense<0.000000e+00> : vector<16x256xf32>
    %15 = tpu.matmul %14, %1, %cst_14 {dimension_numbers = #tpu.dot_dimension_numbers<[1], [0], [0], [1], [0, 0, 1, 1], [], []>} : vector<16x16xf32>, vector<16x256xf32>, vector<16x256xf32> -> vector<16x256xf32>
    %16 = tpu.transpose %15, [1, 0] : vector<16x256xf32> -> vector<256x16xf32>
    %c1_15 = arith.constant 1 : index
    %c0_16 = arith.constant 0 : index
    %c0_17 = arith.constant 0 : index
    %17 = vector.load %arg4[%c1_15, %c0_16, %c0_17] : memref<3x1x16xf32, #tpu.memory_space<vmem>>, vector<1x1x16xf32>
    %18 = vector.shape_cast %17 : vector<1x1x16xf32> to vector<1x16xf32>
    %19 = vector.broadcast %18 : vector<1x16xf32> to vector<256x16xf32>
    %20 = arith.addf %16, %19 : vector<256x16xf32>
    %c0_18 = arith.constant 0 : index
    %c1_19 = arith.constant 1 : index
    %c0_20 = arith.constant 0 : index
    %c0_21 = arith.constant 0 : index
    %21 = vector.load %arg5[%c0_18, %c1_19, %c0_20, %c0_21] : memref<1x3x256x16xf32, #tpu.memory_space<vmem>>, vector<1x1x256x16xf32>
    %22 = vector.shape_cast %21 : vector<1x1x256x16xf32> to vector<256x16xf32>
    %23 = vector.shape_cast %20 : vector<256x16xf32> to vector<1x1x256x16xf32>
    tpu.vector_store %arg5[%c0_18, %c1_19, %c0_20, %c0_21], %23 {strides = array<i32>} : memref<1x3x256x16xf32, #tpu.memory_space<vmem>>, vector<1x1x256x16xf32>,
    %c2 = arith.constant 2 : index
    %c0_22 = arith.constant 0 : index
    %c0_23 = arith.constant 0 : index
    %24 = vector.load %arg3[%c2, %c0_22, %c0_23] : memref<3x16x16xf32, #tpu.memory_space<vmem>>, vector<1x16x16xf32>
    %25 = vector.shape_cast %24 : vector<1x16x16xf32> to vector<16x16xf32>
    %cst_24 = arith.constant dense<0.000000e+00> : vector<16x256xf32>
    %26 = tpu.matmul %25, %1, %cst_24 {dimension_numbers = #tpu.dot_dimension_numbers<[1], [0], [0], [1], [0, 0, 1, 1], [], []>} : vector<16x16xf32>, vector<16x256xf32>, vector<16x256xf32> -> vector<16x256xf32>
    %27 = tpu.transpose %26, [1, 0] : vector<16x256xf32> -> vector<256x16xf32>
    %c2_25 = arith.constant 2 : index
    %c0_26 = arith.constant 0 : index
    %c0_27 = arith.constant 0 : index
    %28 = vector.load %arg4[%c2_25, %c0_26, %c0_27] : memref<3x1x16xf32, #tpu.memory_space<vmem>>, vector<1x1x16xf32>
    %29 = vector.shape_cast %28 : vector<1x1x16xf32> to vector<1x16xf32>
    %30 = vector.broadcast %29 : vector<1x16xf32> to vector<256x16xf32>
    %31 = arith.addf %27, %30 : vector<256x16xf32>
    %c0_28 = arith.constant 0 : index
    %c2_29 = arith.constant 2 : index
    %c0_30 = arith.constant 0 : index
    %c0_31 = arith.constant 0 : index
    %32 = vector.load %arg5[%c0_28, %c2_29, %c0_30, %c0_31] : memref<1x3x256x16xf32, #tpu.memory_space<vmem>>, vector<1x1x256x16xf32>
    %33 = vector.shape_cast %32 : vector<1x1x256x16xf32> to vector<256x16xf32>
    %34 = vector.shape_cast %31 : vector<256x16xf32> to vector<1x1x256x16xf32>
    tpu.vector_store %arg5[%c0_28, %c2_29, %c0_30, %c0_31], %34 {strides = array<i32>} : memref<1x3x256x16xf32, #tpu.memory_space<vmem>>, vector<1x1x256x16xf32>,
    return
  }
  func.func @transform_0(%arg0: i32, %arg1: i32) -> (i32, i32, i32) {
    %c0_i32 = arith.constant 0 : i32
    %c0_i32_0 = arith.constant 0 : i32
    return %arg0, %c0_i32, %arg1 : i32, i32, i32
  }
  func.func @transform_1(%arg0: i32, %arg1: i32) -> (i32, i32, i32) {
    %c0_i32 = arith.constant 0 : i32
    %c0_i32_0 = arith.constant 0 : i32
    %c0_i32_1 = arith.constant 0 : i32
    %c0_i32_2 = arith.constant 0 : i32
    return %c0_i32, %c0_i32_0, %c0_i32_1 : i32, i32, i32
  }
  func.func @transform_2(%arg0: i32, %arg1: i32) -> (i32, i32, i32) {
    %c0_i32 = arith.constant 0 : i32
    %c0_i32_0 = arith.constant 0 : i32
    %c0_i32_1 = arith.constant 0 : i32
    %c0_i32_2 = arith.constant 0 : i32
    return %c0_i32, %c0_i32_0, %c0_i32_1 : i32, i32, i32
  }
  func.func @transform_3(%arg0: i32, %arg1: i32) -> (i32, i32, i32, i32) {
    %c0_i32 = arith.constant 0 : i32
    %c0_i32_0 = arith.constant 0 : i32
    %c0_i32_1 = arith.constant 0 : i32
    return %arg0, %c0_i32, %arg1, %c0_i32_0 : i32, i32, i32, i32
  }
}

</mosaic_0001>

<bundles_post_ra>
// kernel: tpu_custom_call.1
= control target key start
LH: loop header
LB: loop body
LE: loop exit
PB: predicated region body
PF: predicated region fallthrough
CT: control target
= control target key end

     0   :  { %8 = vsyncpa [#allocation3], 0  ;;  %s1720_s0 = inlined_call_operand.hbm [shape: f32[2,16,256], index: 0, kind: input, shape index: {}]   ;;  %s1721_s1 = inlined_call_operand.hbm [shape: f32[3,16,16], index: 1, kind: input, shape index: {}]   ;;  %s1722_s2 = inlined_call_operand.hbm [shape: f32[3,1,16], index: 2, kind: input, shape index: {}]   ;;  %s1723_s3 = inlined_call_operand.vmem [shape: f32[2,3,256,16], index: 3, kind: output, shape index: {}]  }
   0x1   :  { %10 = vsyncpa [#allocation3 + $0x1], 0 }
   0x2   :  { %11 = vsyncpa [#allocation5], 0  ;;  %s1293_s12 = smov 0   ;;  %s1295_s13 = smov 0  }
   0x3   :  { %s1297_s14 = smov 0   ;;  %s1299_s15 = smov 0  }
   0x4   :  { %s1301_s16 = smov 0   ;;  %s1303_s17 = smov 0  }
   0x5 LB: > { %s937_s18 = sadd.s32 4294967295, %s1264_s17   ;;  %p51_p0 = scmp.ne.s32.totalorder %s1248_s13, %s1244_s12  ;;  %s1264_s17 = sphi %s1303_s17, %s17_s17   ;;  %s1260_s16 = sphi %s1301_s16, %s1732_s16   ;;  %s1256_s15 = sphi %s1299_s15, %s1731_s15   ;;  %s1252_s14 = sphi %s1297_s14, %s1730_s14   ;;  %s1248_s13 = sphi %s1295_s13, %s1729_s13   ;;  %s1244_s12 = sphi %s1293_s12, %s1728_s12  }
   0x6   : > { %p1323_p1 = scmp.eq.s32.totalorder %s937_s18, 0  ;;  %p939_p2 = scmp.ge.s32.totalorder %s1264_s17, 1 }
   0x7   : > { %p132_p3 = scmp.lt.s32.totalorder %s1264_s17, 3  ;;  %s143_s23 = sshll.u32 %s1721_s1, 4  ;;  %s144_s23 = int_to_ptr.hbm [resolvable:$true] %s143_s23 }
   0x8   : > { %p1331_p4 = por %p1323_p1, %p51_p0  ;;  %s1266_s25 = smov [#allocation4]  }
   0x9   : > { %p1338_p5 = pnand %p939_p2, %p132_p3  ;;  %s145_s26 = sshll.u32 %s1266_s25, 4  ;;  %s146_s26 = int_to_ptr.vmem [resolvable:$true] %s145_s26 }
   0xa   : > { %s157_s29 = sshll.u32 %s1722_s2, 4  ;;  %s1267_s30 = smov 128   ;;  %s158_s29 = int_to_ptr.hbm [resolvable:$true] %s157_s29 }
   0xb   : > { %p1045_p6 = pneg %p1338_p5  ;;  %s1268_s4 = smov 8  }
   0xc   : > { %s1269_s5 = smov [#allocation6]   ;;  %s1270_s7 = smov 16  }
   0xd   : > { %p1046_p7 = pnand %p1045_p6, %p1323_p1  ;;  %s159_s6 = sshll.u32 %s1269_s5, 4  ;;  %s160_s6 = int_to_ptr.vmem [resolvable:$true] %s159_s6 }
   0xe   : > { %s1271_s8 = smov 1   ;;  %s29_s9 = sadd.s32 1, %s1260_s16 }
   0xf   : > { %1048 = dma.hbm_to_vmem [thread:$0]  (!%p1046_p7), %s144_s23, 768, %s146_s26, [#allocation5], %s1267_s30, %s1267_s30, %s1268_s4  }
  0x10   : > { %1051 = dma.hbm_to_vmem [thread:$0]  (!%p1046_p7), %s158_s29, 48, %s160_s6, [#allocation5], %s1270_s7, %s1270_s7, %s1271_s8  }
  0x11   : > { %s38_s10 = sadd.s32 1, %s1252_s14  ;;  %p31_p8 = scmp.ge.s32.totalorder %s29_s9, 2 }
  0x12   : > { %p45_p9 = scmp.ne.s32.totalorder %s1252_s14, %s1248_s13  ;;  %p46_p10 = scmp.eq.s32.totalorder %s1264_s17, 0 }
  0x13   : > { %p1058_p11 = scmp.lt.s32.totalorder %s1264_s17, 2  ;;  %s1734_s9 = smov (%p31_p8, %s29_s9), 0 }
  0x14   : > { %p1359_p12 = por %p46_p10, %p45_p9  ;;  %s173_s12 = sand.u32 1, %s1252_s14  }
  0x15   : > { %s33_s18 = ssub.s32 %s1260_s16, %s1734_s9  ;;  %s943_s21 = sshll.u32 %s173_s12, 5 }
  0x16   : > { %p36_p13 = scmp.eq.s32.totalorder %s33_s18, 0  ;;  %s1029_s22 = sshll.u32 %s1260_s16, 5 }
  0x17   : > { %s184_s27 = scalar_lea.hbm %s1720_s0, %s1029_s22  ;;  %s177_s28 = scalar_lea.vmem [#allocation2], %s943_s21 }
  0x18   : > { %s1368_s23 = scalar_select %p36_p13, %s1252_s14, %s38_s10  }
  0x19   : > { %s187_s29 = sshll.u32 %s177_s28, 4  ;;  %s185_s30 = sshll.u32 %s184_s27, 4  ;;  %s188_s29 = int_to_ptr.vmem [resolvable:$true] %s187_s29  ;;  %s186_s30 = int_to_ptr.hbm [resolvable:$true] %s185_s30 }
  0x1a   : > { %p1053_p0 = pnand %p1058_p11, %p1359_p12  ;;  %s174_s4 = scalar_lea.sflag [#allocation3], %s173_s12 }
  0x1b   : > { %s1272_s5 = smov 256   ;;  %199 = sbr.rel (%p1338_p5) target bundleno = 584 (0x248), region = 32 }
  0x1c   : > { %1055 = dma.hbm_to_vmem [thread:$0]  (!%p1053_p0), %s186_s30, 512, %s188_s29, %s174_s4, %s1272_s5, %s1272_s5, %s1270_s7  }
  0x1d   : > { %s201_s6 = sand.u32 (!%p1338_p5), 1, %s1248_s13  }
  0x1e   : > { %s947_s8 = sshll.u32 (!%p1338_p5), %s201_s6, 5  ;;  %s202_s10 = scalar_lea.sflag (!%p1338_p5), [#allocation3], %s201_s6 }
  0x1f   : > { %s205_s18 = scalar_lea.vmem (!%p1338_p5), [#allocation2], %s947_s8 }
  0x20   : > { %1235 = dma.done.wait (%p1331_p4), %s202_s10, 512  }
  0x21   : > { %1237 = vsyncadd (%p1331_p4), %s202_s10, 4294966784 }
  0x22   : > { %1239 = dma.done.wait (%p1323_p1), [#allocation5], 816  }
  0x23   : > { %1241 = vsyncadd (%p1323_p1), [#allocation5], 4294966480  ;;  %v256_v0 = vld [vmem:[%s205_s18 + $0x10] sm:$0xff]  ;;  %v254_v1 = vld [vmem:[%s205_s18] sm:$0xff]  ;;  %vm260_vm0 = vcmask 130048   ;;  %p245_p1 = scmp.lt.s32.totalorder %s1256_s15, 1 }
  0x24   : > { %281 = vmatpush.msra.mxu0 %v256_v0  ;;  %1030 = vmatpush.msra.mxu2 %v256_v0  ;;  %v258_v2 = vld [vmem:[#allocation4] sm:$0xff]  ;;  %v259_v3 = vld [vmem:[#allocation4 + $0x8] sm:$0xff]  ;;  %v257_v4 = vld [vmem:[%s205_s18 + $0x18] sm:$0xff] }
  0x25   : > { %304 = vmatpush.msra.mxu1 %v257_v4  ;;  %1032 = vmatpush.msra.mxu3 %v257_v4  ;;  %v255_v5 = vld [vmem:[%s205_s18 + $0x8] sm:$0xff]  ;;  %v446_v6 = vld [vmem:[#allocation4 + $0x10] sm:$0xff]  ;;  %v447_v7 = vld [vmem:[#allocation4 + $0x18] sm:$0xff]  ;;  %s1736_s15 = smov (!%p245_p1, %s1256_s15), 1 }
  0x26   : > { %282 = vmatpush.msra.mxu0 %v254_v1  ;;  %1031 = vmatpush.msra.mxu2 %v254_v1  ;;  %v635_v8 = vld [vmem:[#allocation4 + $0x20] sm:$0xff]  ;;  %v636_v9 = vld [vmem:[#allocation4 + $0x28] sm:$0xff]  ;;  %s1034_s19 = smul.u32 768, %s1736_s15  ;;  %v1403_v22 = vld [vmem:[#allocation6] ss:$0 sm:$0xff] }
  0x27   : > { %951 = vmatmul.msk.f32.vlgmr.msra.gmra.mxu0 %vm260_vm0, %v258_v2  ;;  %952 = vmatmul.msk.f32.vlgmr.msra.gmra.mxu2 %vm260_vm0, %v259_v3  ;;  %v1410_v23 = vld [vmem:[#allocation6 + $0x1] ss:$0 sm:$0xff] }
  0x28   : > { %468 = vmatpush.msrb.mxu2 %v256_v0  ;;  %305 = vmatpush.msra.mxu1 %v255_v5  ;;  %s1408_s7 = scalar_lea.vmem %s1723_s3, %s1034_s19 }
  0x29   : > { %953 = vmatmul.msk.f32.vlgmr.msra.gmra.mxu1 %vm260_vm0, %v258_v2  ;;  %1033 = vmatpush.msra.mxu3 %v255_v5 }
  0x2a   : > { %469 = vmatpush.msrb.mxu2 %v254_v1  ;;  %954 = vmatmul.msk.f32.vlgmr.msra.gmra.mxu3 %vm260_vm0, %v259_v3 }
  0x2b   : > { %491 = vmatpush.msrb.mxu3 %v257_v4  ;;  %657 = vmatpush.msrb.mxu0 %v256_v0 }
  0x2c   : > { %680 = vmatpush.msrb.mxu1 %v257_v4 }
  0x2d   : > { %492 = vmatpush.msrb.mxu3 %v255_v5  ;;  %658 = vmatpush.msrb.mxu0 %v254_v1 }
  0x2e   : > { %681 = vmatpush.msrb.mxu1 %v255_v5 }
  0x2f   : > { %955 = vmatmul.msk.f32.vlgmr.msrb.gmra.mxu2 %vm260_vm0, %v446_v6  ;;  %991 = vmatmul.msk.f32.vlgmr.msrb.gmra.mxu0 %vm260_vm0, %v635_v8 }
  0x31   : > { %993 = vmatmul.msk.f32.vlgmr.msrb.gmra.mxu1 %vm260_vm0, %v635_v8 }
  0x32   : > { %957 = vmatmul.msk.f32.vlgmr.msrb.gmra.mxu3 %vm260_vm0, %v446_v6 }
  0x37   : > { %956 = vmatmul.msk.f32.gmra.mxu2 %vm260_vm0, %v447_v7  ;;  %992 = vmatmul.msk.f32.gmra.mxu0 %vm260_vm0, %v636_v9 }
  0x39   : > { %994 = vmatmul.msk.f32.gmra.mxu1 %vm260_vm0, %v636_v9 }
  0x3a   : > { %958 = vmatmul.msk.f32.gmra.mxu3 %vm260_vm0, %v447_v7 }
  0xa4   : > { %v284_v10 = vpop.f32.mrf.mxu0 }
  0xa5   : > { %313 = vxpose.xlu0.b32.start [1/2] (short) %v284_v10, 128 }
  0xa6   : > { %v307_v11 = vpop.f32.mrf.mxu1 }
  0xa7   : > { %345 = vxpose.xlu1.b32.start [1/2] (short) %v307_v11, 128 }
  0xaa   : > { %v287_v12 = vpop.f32.mrf.mxu2 }
  0xac   : > { %v660_v17 = vpop.f32.mrf.mxu0 }
  0xad   : > { %314 = vxpose.xlu0.b32.end [2/2] (short) %v287_v12, 128  ;;  %v310_v13 = vpop.f32.mrf.mxu3 }
  0xae   : > { %v683_v20 = vpop.f32.mrf.mxu1 }
  0xaf   : > { %346 = vxpose.xlu1.b32.end [2/2] (short) %v310_v13, 128 }
  0xb2   : > { %v471_v14 = vpop.f32.mrf.mxu2 }
  0xb3   : > { %500 = vxpose.xlu2.b32.start [1/2] (short) %v471_v14, 128 }
  0xb4   : > { %v663_v19 = vpop.f32.mrf.mxu0 }
  0xb5   : > { %v494_v16 = vpop.f32.mrf.mxu3 }
  0xb6   : > { %v686_v21 = vpop.f32.mrf.mxu1 }
  0xba   : > { %v474_v15 = vpop.f32.mrf.mxu2 }
  0xbb   : > { %501 = vxpose.xlu2.b32.end [2/2] (short) %v474_v15, 128 }
  0xbd   : > { %v497_v18 = vpop.f32.mrf.mxu3 }
 0x125   : > { %532 = vxpose.xlu0.b32.start [1/2] (short) %v494_v16, 128 }
 0x127   : > { %689 = vxpose.xlu1.b32.start [1/2] (short) %v660_v17, 128 }
 0x12d   : > { %533 = vxpose.xlu0.b32.end [2/2] (short) %v497_v18, 128 }
 0x12f   : > { %690 = vxpose.xlu1.b32.end [2/2] (short) %v663_v19, 128 }
 0x133   : > { %721 = vxpose.xlu2.b32.start [1/2] (short) %v683_v20, 128 }
 0x13b   : > { %722 = vxpose.xlu2.b32.end [2/2] (short) %v686_v21, 128 }
 0x149   : > { %v329_v24 = vpop.trf.xlu0 }
 0x14a   : > { %v381_v25 = vadd.f32 %v1403_v22, %v329_v24 }
 0x14b   : > { %v361_v26 = vpop.trf.xlu1 }
 0x14c   : > { %v397_v27 = vadd.f32 %v1403_v22, %v361_v26  ;;  %v516_v28 = vpop.trf.xlu2  ;;  %413 = vst.msk [vmem:[%s1408_s7] sm:$0xff] %vm260_vm0, %v381_v25 }
 0x14d   : > { %v569_v29 = vadd.f32 %v1410_v23, %v516_v28 }
 0x14e   : > { %429 = vst.msk [vmem:[%s1408_s7 + $0x80] sm:$0xff] %vm260_vm0, %v397_v27 }
 0x14f   : > { %959 = vst.msk [vmem:[%s1408_s7 + $0x100] sm:$0xff] %vm260_vm0, %v569_v29 }
 0x151   : > { %v330_v30 = vpop.trf.xlu0 }
 0x152   : > { %v382_v31 = vadd.f32 %v1403_v22, %v330_v30 }
 0x153   : > { %v362_v32 = vpop.trf.xlu1 }
 0x154   : > { %v398_v33 = vadd.f32 %v1403_v22, %v362_v32  ;;  %v517_v34 = vpop.trf.xlu2  ;;  %414 = vst.msk [vmem:[%s1408_s7 + $0x8] sm:$0xff] %vm260_vm0, %v382_v31 }
 0x155   : > { %v570_v35 = vadd.f32 %v1410_v23, %v517_v34 }
 0x156   : > { %430 = vst.msk [vmem:[%s1408_s7 + $0x88] sm:$0xff] %vm260_vm0, %v398_v33 }
 0x157   : > { %960 = vst.msk [vmem:[%s1408_s7 + $0x108] sm:$0xff] %vm260_vm0, %v570_v35 }
 0x159   : > { %v331_v36 = vpop.trf.xlu0 }
 0x15a   : > { %v383_v37 = vadd.f32 %v1403_v22, %v331_v36 }
 0x15b   : > { %v363_v38 = vpop.trf.xlu1 }
 0x15c   : > { %v399_v39 = vadd.f32 %v1403_v22, %v363_v38  ;;  %v518_v40 = vpop.trf.xlu2  ;;  %415 = vst.msk [vmem:[%s1408_s7 + $0x10] sm:$0xff] %vm260_vm0, %v383_v37 }
 0x15d   : > { %v571_v41 = vadd.f32 %v1410_v23, %v518_v40 }
 0x15e   : > { %431 = vst.msk [vmem:[%s1408_s7 + $0x90] sm:$0xff] %vm260_vm0, %v399_v39 }
 0x15f   : > { %961 = vst.msk [vmem:[%s1408_s7 + $0x110] sm:$0xff] %vm260_vm0, %v571_v41 }
 0x161   : > { %v332_v42 = vpop.trf.xlu0 }
 0x162   : > { %v384_v43 = vadd.f32 %v1403_v22, %v332_v42 }
 0x163   : > { %v364_v44 = vpop.trf.xlu1 }
 0x164   : > { %v400_v45 = vadd.f32 %v1403_v22, %v364_v44  ;;  %v519_v46 = vpop.trf.xlu2  ;;  %416 = vst.msk [vmem:[%s1408_s7 + $0x18] sm:$0xff] %vm260_vm0, %v384_v43 }
 0x165   : > { %v572_v47 = vadd.f32 %v1410_v23, %v519_v46 }
 0x166   : > { %432 = vst.msk [vmem:[%s1408_s7 + $0x98] sm:$0xff] %vm260_vm0, %v400_v45 }
 0x167   : > { %962 = vst.msk [vmem:[%s1408_s7 + $0x118] sm:$0xff] %vm260_vm0, %v572_v47 }
 0x169   : > { %v333_v48 = vpop.trf.xlu0 }
 0x16a   : > { %v385_v49 = vadd.f32 %v1403_v22, %v333_v48 }
 0x16b   : > { %v365_v50 = vpop.trf.xlu1 }
 0x16c   : > { %v401_v51 = vadd.f32 %v1403_v22, %v365_v50  ;;  %v520_v52 = vpop.trf.xlu2  ;;  %417 = vst.msk [vmem:[%s1408_s7 + $0x20] sm:$0xff] %vm260_vm0, %v385_v49 }
 0x16d   : > { %v573_v53 = vadd.f32 %v1410_v23, %v520_v52 }
 0x16e   : > { %433 = vst.msk [vmem:[%s1408_s7 + $0xa0] sm:$0xff] %vm260_vm0, %v401_v51 }
 0x16f   : > { %963 = vst.msk [vmem:[%s1408_s7 + $0x120] sm:$0xff] %vm260_vm0, %v573_v53 }
 0x171   : > { %v334_v54 = vpop.trf.xlu0 }
 0x172   : > { %v386_v55 = vadd.f32 %v1403_v22, %v334_v54 }
 0x173   : > { %v366_v56 = vpop.trf.xlu1 }
 0x174   : > { %v402_v57 = vadd.f32 %v1403_v22, %v366_v56  ;;  %v521_v58 = vpop.trf.xlu2  ;;  %418 = vst.msk [vmem:[%s1408_s7 + $0x28] sm:$0xff] %vm260_vm0, %v386_v55 }
 0x175   : > { %v574_v59 = vadd.f32 %v1410_v23, %v521_v58  ;;  %v1556_v58 = vld [vmem:[#allocation6 + $0x2] ss:$0 sm:$0xff] }
 0x176   : > { %434 = vst.msk [vmem:[%s1408_s7 + $0xa8] sm:$0xff] %vm260_vm0, %v402_v57 }
 0x177   : > { %964 = vst.msk [vmem:[%s1408_s7 + $0x128] sm:$0xff] %vm260_vm0, %v574_v59 }
 0x179   : > { %v335_v60 = vpop.trf.xlu0 }
 0x17a   : > { %v387_v61 = vadd.f32 %v1403_v22, %v335_v60 }
 0x17b   : > { %v367_v62 = vpop.trf.xlu1 }
 0x17c   : > { %v403_v63 = vadd.f32 %v1403_v22, %v367_v62  ;;  %v522_v0 = vpop.trf.xlu2  ;;  %419 = vst.msk [vmem:[%s1408_s7 + $0x30] sm:$0xff] %vm260_vm0, %v387_v61 }
 0x17d   : > { %v575_v1 = vadd.f32 %v1410_v23, %v522_v0 }
 0x17e   : > { %435 = vst.msk [vmem:[%s1408_s7 + $0xb0] sm:$0xff] %vm260_vm0, %v403_v63 }
 0x17f   : > { %965 = vst.msk [vmem:[%s1408_s7 + $0x130] sm:$0xff] %vm260_vm0, %v575_v1 }
 0x181   : > { %v336_v2 = vpop.trf.xlu0 }
 0x182   : > { %v388_v3 = vadd.f32 %v1403_v22, %v336_v2 }
 0x183   : > { %v368_v4 = vpop.trf.xlu1 }
 0x184   : > { %v404_v5 = vadd.f32 %v1403_v22, %v368_v4  ;;  %v523_v6 = vpop.trf.xlu2  ;;  %420 = vst.msk [vmem:[%s1408_s7 + $0x38] sm:$0xff] %vm260_vm0, %v388_v3 }
 0x185   : > { %v576_v7 = vadd.f32 %v1410_v23, %v523_v6 }
 0x186   : > { %436 = vst.msk [vmem:[%s1408_s7 + $0xb8] sm:$0xff] %vm260_vm0, %v404_v5 }
 0x187   : > { %966 = vst.msk [vmem:[%s1408_s7 + $0x138] sm:$0xff] %vm260_vm0, %v576_v7 }
 0x189   : > { %v337_v8 = vpop.trf.xlu0 }
 0x18a   : > { %v389_v9 = vadd.f32 %v1403_v22, %v337_v8 }
 0x18b   : > { %v369_v10 = vpop.trf.xlu1 }
 0x18c   : > { %v405_v11 = vadd.f32 %v1403_v22, %v369_v10  ;;  %v524_v12 = vpop.trf.xlu2  ;;  %421 = vst.msk [vmem:[%s1408_s7 + $0x40] sm:$0xff] %vm260_vm0, %v389_v9 }
 0x18d   : > { %v577_v13 = vadd.f32 %v1410_v23, %v524_v12 }
 0x18e   : > { %437 = vst.msk [vmem:[%s1408_s7 + $0xc0] sm:$0xff] %vm260_vm0, %v405_v11 }
 0x18f   : > { %967 = vst.msk [vmem:[%s1408_s7 + $0x140] sm:$0xff] %vm260_vm0, %v577_v13 }
 0x191   : > { %v338_v14 = vpop.trf.xlu0 }
 0x192   : > { %v390_v15 = vadd.f32 %v1403_v22, %v338_v14 }
 0x193   : > { %v370_v16 = vpop.trf.xlu1 }
 0x194   : > { %v406_v17 = vadd.f32 %v1403_v22, %v370_v16  ;;  %v525_v18 = vpop.trf.xlu2  ;;  %422 = vst.msk [vmem:[%s1408_s7 + $0x48] sm:$0xff] %vm260_vm0, %v390_v15 }
 0x195   : > { %v578_v19 = vadd.f32 %v1410_v23, %v525_v18 }
 0x196   : > { %438 = vst.msk [vmem:[%s1408_s7 + $0xc8] sm:$0xff] %vm260_vm0, %v406_v17 }
 0x197   : > { %968 = vst.msk [vmem:[%s1408_s7 + $0x148] sm:$0xff] %vm260_vm0, %v578_v19 }
 0x199   : > { %v339_v20 = vpop.trf.xlu0 }
 0x19a   : > { %v391_v21 = vadd.f32 %v1403_v22, %v339_v20 }
 0x19b   : > { %v371_v24 = vpop.trf.xlu1 }
 0x19c   : > { %v407_v25 = vadd.f32 %v1403_v22, %v371_v24  ;;  %v526_v26 = vpop.trf.xlu2  ;;  %423 = vst.msk [vmem:[%s1408_s7 + $0x50] sm:$0xff] %vm260_vm0, %v391_v21 }
 0x19d   : > { %v579_v27 = vadd.f32 %v1410_v23, %v526_v26 }
 0x19e   : > { %439 = vst.msk [vmem:[%s1408_s7 + $0xd0] sm:$0xff] %vm260_vm0, %v407_v25 }
 0x19f   : > { %969 = vst.msk [vmem:[%s1408_s7 + $0x150] sm:$0xff] %vm260_vm0, %v579_v27 }
 0x1a1   : > { %v340_v28 = vpop.trf.xlu0 }
 0x1a2   : > { %v392_v29 = vadd.f32 %v1403_v22, %v340_v28 }
 0x1a3   : > { %v372_v30 = vpop.trf.xlu1 }
 0x1a4   : > { %v408_v31 = vadd.f32 %v1403_v22, %v372_v30  ;;  %v527_v32 = vpop.trf.xlu2  ;;  %424 = vst.msk [vmem:[%s1408_s7 + $0x58] sm:$0xff] %vm260_vm0, %v392_v29 }
 0x1a5   : > { %v580_v33 = vadd.f32 %v1410_v23, %v527_v32 }
 0x1a6   : > { %440 = vst.msk [vmem:[%s1408_s7 + $0xd8] sm:$0xff] %vm260_vm0, %v408_v31 }
 0x1a7   : > { %970 = vst.msk [vmem:[%s1408_s7 + $0x158] sm:$0xff] %vm260_vm0, %v580_v33 }
 0x1a9   : > { %v341_v34 = vpop.trf.xlu0 }
 0x1aa   : > { %v393_v35 = vadd.f32 %v1403_v22, %v341_v34 }
 0x1ab   : > { %v373_v36 = vpop.trf.xlu1 }
 0x1ac   : > { %v409_v37 = vadd.f32 %v1403_v22, %v373_v36  ;;  %v528_v38 = vpop.trf.xlu2  ;;  %425 = vst.msk [vmem:[%s1408_s7 + $0x60] sm:$0xff] %vm260_vm0, %v393_v35 }
 0x1ad   : > { %v581_v39 = vadd.f32 %v1410_v23, %v528_v38 }
 0x1ae   : > { %441 = vst.msk [vmem:[%s1408_s7 + $0xe0] sm:$0xff] %vm260_vm0, %v409_v37 }
 0x1af   : > { %971 = vst.msk [vmem:[%s1408_s7 + $0x160] sm:$0xff] %vm260_vm0, %v581_v39 }
 0x1b1   : > { %v342_v40 = vpop.trf.xlu0 }
 0x1b2   : > { %v394_v41 = vadd.f32 %v1403_v22, %v342_v40 }
 0x1b3   : > { %v374_v42 = vpop.trf.xlu1 }
 0x1b4   : > { %v410_v43 = vadd.f32 %v1403_v22, %v374_v42  ;;  %v529_v44 = vpop.trf.xlu2  ;;  %426 = vst.msk [vmem:[%s1408_s7 + $0x68] sm:$0xff] %vm260_vm0, %v394_v41 }
 0x1b5   : > { %v582_v45 = vadd.f32 %v1410_v23, %v529_v44 }
 0x1b6   : > { %442 = vst.msk [vmem:[%s1408_s7 + $0xe8] sm:$0xff] %vm260_vm0, %v410_v43 }
 0x1b7   : > { %972 = vst.msk [vmem:[%s1408_s7 + $0x168] sm:$0xff] %vm260_vm0, %v582_v45 }
 0x1b9   : > { %v343_v46 = vpop.trf.xlu0 }
 0x1ba   : > { %v395_v47 = vadd.f32 %v1403_v22, %v343_v46 }
 0x1bb   : > { %v375_v48 = vpop.trf.xlu1 }
 0x1bc   : > { %v411_v49 = vadd.f32 %v1403_v22, %v375_v48  ;;  %v530_v50 = vpop.trf.xlu2  ;;  %427 = vst.msk [vmem:[%s1408_s7 + $0x70] sm:$0xff] %vm260_vm0, %v395_v47 }
 0x1bd   : > { %v583_v51 = vadd.f32 %v1410_v23, %v530_v50 }
 0x1be   : > { %443 = vst.msk [vmem:[%s1408_s7 + $0xf0] sm:$0xff] %vm260_vm0, %v411_v49 }
 0x1bf   : > { %973 = vst.msk [vmem:[%s1408_s7 + $0x170] sm:$0xff] %vm260_vm0, %v583_v51 }
 0x1c1   : > { %v344_v52 = vpop.trf.xlu0 }
 0x1c2   : > { %v396_v53 = vadd.f32 %v1403_v22, %v344_v52 }
 0x1c3   : > { %v376_v54 = vpop.trf.xlu1 }
 0x1c4   : > { %v412_v55 = vadd.f32 %v1403_v22, %v376_v54  ;;  %v531_v56 = vpop.trf.xlu2  ;;  %428 = vst.msk [vmem:[%s1408_s7 + $0x78] sm:$0xff] %vm260_vm0, %v396_v53 }
 0x1c5   : > { %v584_v57 = vadd.f32 %v1410_v23, %v531_v56 }
 0x1c6   : > { %444 = vst.msk [vmem:[%s1408_s7 + $0xf8] sm:$0xff] %vm260_vm0, %v412_v55 }
 0x1c7   : > { %974 = vst.msk [vmem:[%s1408_s7 + $0x178] sm:$0xff] %vm260_vm0, %v584_v57 }
 0x1c9   : > { %v548_v59 = vpop.trf.xlu0 }
 0x1ca   : > { %v585_v60 = vadd.f32 %v1410_v23, %v548_v59 }
 0x1cb   : > { %v705_v61 = vpop.trf.xlu1 }
 0x1cc   : > { %v737_v62 = vpop.trf.xlu2  ;;  %975 = vst.msk [vmem:[%s1408_s7 + $0x180] sm:$0xff] %vm260_vm0, %v585_v60  ;;  %v758_v22 = vadd.f32 %v1556_v58, %v705_v61 }
 0x1cd   : > { %v774_v63 = vadd.f32 %v1556_v58, %v737_v62 }
 0x1ce   : > { %995 = vst.msk [vmem:[%s1408_s7 + $0x200] sm:$0xff] %vm260_vm0, %v758_v22 }
 0x1cf   : > { %1011 = vst.msk [vmem:[%s1408_s7 + $0x280] sm:$0xff] %vm260_vm0, %v774_v63 }
 0x1d1   : > { %v549_v0 = vpop.trf.xlu0 }
 0x1d2   : > { %v586_v1 = vadd.f32 %v1410_v23, %v549_v0 }
 0x1d3   : > { %v706_v2 = vpop.trf.xlu1 }
 0x1d4   : > { %v738_v3 = vpop.trf.xlu2  ;;  %976 = vst.msk [vmem:[%s1408_s7 + $0x188] sm:$0xff] %vm260_vm0, %v586_v1  ;;  %v759_v4 = vadd.f32 %v1556_v58, %v706_v2 }
 0x1d5   : > { %v775_v5 = vadd.f32 %v1556_v58, %v738_v3 }
 0x1d6   : > { %996 = vst.msk [vmem:[%s1408_s7 + $0x208] sm:$0xff] %vm260_vm0, %v759_v4 }
 0x1d7   : > { %1012 = vst.msk [vmem:[%s1408_s7 + $0x288] sm:$0xff] %vm260_vm0, %v775_v5 }
 0x1d9   : > { %v550_v6 = vpop.trf.xlu0 }
 0x1da   : > { %v587_v7 = vadd.f32 %v1410_v23, %v550_v6 }
 0x1db   : > { %v707_v8 = vpop.trf.xlu1 }
 0x1dc   : > { %v739_v9 = vpop.trf.xlu2  ;;  %977 = vst.msk [vmem:[%s1408_s7 + $0x190] sm:$0xff] %vm260_vm0, %v587_v7  ;;  %v760_v10 = vadd.f32 %v1556_v58, %v707_v8 }
 0x1dd   : > { %v776_v11 = vadd.f32 %v1556_v58, %v739_v9 }
 0x1de   : > { %997 = vst.msk [vmem:[%s1408_s7 + $0x210] sm:$0xff] %vm260_vm0, %v760_v10 }
 0x1df   : > { %1013 = vst.msk [vmem:[%s1408_s7 + $0x290] sm:$0xff] %vm260_vm0, %v776_v11 }
 0x1e1   : > { %v551_v12 = vpop.trf.xlu0 }
 0x1e2   : > { %v588_v13 = vadd.f32 %v1410_v23, %v551_v12 }
 0x1e3   : > { %v708_v14 = vpop.trf.xlu1 }
 0x1e4   : > { %v740_v15 = vpop.trf.xlu2  ;;  %978 = vst.msk [vmem:[%s1408_s7 + $0x198] sm:$0xff] %vm260_vm0, %v588_v13  ;;  %v761_v16 = vadd.f32 %v1556_v58, %v708_v14 }
 0x1e5   : > { %v777_v17 = vadd.f32 %v1556_v58, %v740_v15 }
 0x1e6   : > { %998 = vst.msk [vmem:[%s1408_s7 + $0x218] sm:$0xff] %vm260_vm0, %v761_v16 }
 0x1e7   : > { %1014 = vst.msk [vmem:[%s1408_s7 + $0x298] sm:$0xff] %vm260_vm0, %v777_v17 }
 0x1e9   : > { %v552_v18 = vpop.trf.xlu0 }
 0x1ea   : > { %v589_v19 = vadd.f32 %v1410_v23, %v552_v18 }
 0x1eb   : > { %v709_v20 = vpop.trf.xlu1 }
 0x1ec   : > { %v741_v21 = vpop.trf.xlu2  ;;  %979 = vst.msk [vmem:[%s1408_s7 + $0x1a0] sm:$0xff] %vm260_vm0, %v589_v19  ;;  %v762_v24 = vadd.f32 %v1556_v58, %v709_v20 }
 0x1ed   : > { %v778_v25 = vadd.f32 %v1556_v58, %v741_v21 }
 0x1ee   : > { %999 = vst.msk [vmem:[%s1408_s7 + $0x220] sm:$0xff] %vm260_vm0, %v762_v24 }
 0x1ef   : > { %1015 = vst.msk [vmem:[%s1408_s7 + $0x2a0] sm:$0xff] %vm260_vm0, %v778_v25 }
 0x1f1   : > { %v553_v26 = vpop.trf.xlu0 }
 0x1f2   : > { %v590_v27 = vadd.f32 %v1410_v23, %v553_v26 }
 0x1f3   : > { %v710_v28 = vpop.trf.xlu1 }
 0x1f4   : > { %v742_v29 = vpop.trf.xlu2  ;;  %980 = vst.msk [vmem:[%s1408_s7 + $0x1a8] sm:$0xff] %vm260_vm0, %v590_v27  ;;  %v763_v30 = vadd.f32 %v1556_v58, %v710_v28 }
 0x1f5   : > { %v779_v31 = vadd.f32 %v1556_v58, %v742_v29 }
 0x1f6   : > { %1000 = vst.msk [vmem:[%s1408_s7 + $0x228] sm:$0xff] %vm260_vm0, %v763_v30 }
 0x1f7   : > { %1016 = vst.msk [vmem:[%s1408_s7 + $0x2a8] sm:$0xff] %vm260_vm0, %v779_v31 }
 0x1f9   : > { %v554_v32 = vpop.trf.xlu0 }
 0x1fa   : > { %v591_v33 = vadd.f32 %v1410_v23, %v554_v32 }
 0x1fb   : > { %v711_v34 = vpop.trf.xlu1 }
 0x1fc   : > { %v743_v35 = vpop.trf.xlu2  ;;  %981 = vst.msk [vmem:[%s1408_s7 + $0x1b0] sm:$0xff] %vm260_vm0, %v591_v33  ;;  %v764_v36 = vadd.f32 %v1556_v58, %v711_v34 }
 0x1fd   : > { %v780_v37 = vadd.f32 %v1556_v58, %v743_v35 }
 0x1fe   : > { %1001 = vst.msk [vmem:[%s1408_s7 + $0x230] sm:$0xff] %vm260_vm0, %v764_v36 }
 0x1ff   : > { %1017 = vst.msk [vmem:[%s1408_s7 + $0x2b0] sm:$0xff] %vm260_vm0, %v780_v37 }
 0x201   : > { %v555_v38 = vpop.trf.xlu0 }
 0x202   : > { %v592_v39 = vadd.f32 %v1410_v23, %v555_v38 }
 0x203   : > { %v712_v40 = vpop.trf.xlu1 }
 0x204   : > { %v744_v41 = vpop.trf.xlu2  ;;  %982 = vst.msk [vmem:[%s1408_s7 + $0x1b8] sm:$0xff] %vm260_vm0, %v592_v39  ;;  %v765_v42 = vadd.f32 %v1556_v58, %v712_v40 }
 0x205   : > { %v781_v43 = vadd.f32 %v1556_v58, %v744_v41 }
 0x206   : > { %1002 = vst.msk [vmem:[%s1408_s7 + $0x238] sm:$0xff] %vm260_vm0, %v765_v42 }
 0x207   : > { %1018 = vst.msk [vmem:[%s1408_s7 + $0x2b8] sm:$0xff] %vm260_vm0, %v781_v43 }
 0x209   : > { %v556_v44 = vpop.trf.xlu0 }
 0x20a   : > { %v593_v45 = vadd.f32 %v1410_v23, %v556_v44 }
 0x20b   : > { %v713_v46 = vpop.trf.xlu1 }
 0x20c   : > { %v745_v47 = vpop.trf.xlu2  ;;  %983 = vst.msk [vmem:[%s1408_s7 + $0x1c0] sm:$0xff] %vm260_vm0, %v593_v45  ;;  %v766_v48 = vadd.f32 %v1556_v58, %v713_v46 }
 0x20d   : > { %v782_v49 = vadd.f32 %v1556_v58, %v745_v47 }
 0x20e   : > { %1003 = vst.msk [vmem:[%s1408_s7 + $0x240] sm:$0xff] %vm260_vm0, %v766_v48 }
 0x20f   : > { %1019 = vst.msk [vmem:[%s1408_s7 + $0x2c0] sm:$0xff] %vm260_vm0, %v782_v49 }
 0x211   : > { %v557_v50 = vpop.trf.xlu0 }
 0x212   : > { %v594_v51 = vadd.f32 %v1410_v23, %v557_v50 }
 0x213   : > { %v714_v52 = vpop.trf.xlu1 }
 0x214   : > { %v746_v53 = vpop.trf.xlu2  ;;  %984 = vst.msk [vmem:[%s1408_s7 + $0x1c8] sm:$0xff] %vm260_vm0, %v594_v51  ;;  %v767_v54 = vadd.f32 %v1556_v58, %v714_v52 }
 0x215   : > { %v783_v55 = vadd.f32 %v1556_v58, %v746_v53 }
 0x216   : > { %1004 = vst.msk [vmem:[%s1408_s7 + $0x248] sm:$0xff] %vm260_vm0, %v767_v54 }
 0x217   : > { %1020 = vst.msk [vmem:[%s1408_s7 + $0x2c8] sm:$0xff] %vm260_vm0, %v783_v55 }
 0x219   : > { %v558_v56 = vpop.trf.xlu0 }
 0x21a   : > { %v595_v57 = vadd.f32 %v1410_v23, %v558_v56 }
 0x21b   : > { %v715_v59 = vpop.trf.xlu1 }
 0x21c   : > { %v747_v60 = vpop.trf.xlu2  ;;  %985 = vst.msk [vmem:[%s1408_s7 + $0x1d0] sm:$0xff] %vm260_vm0, %v595_v57  ;;  %v768_v61 = vadd.f32 %v1556_v58, %v715_v59 }
 0x21d   : > { %v784_v62 = vadd.f32 %v1556_v58, %v747_v60 }
 0x21e   : > { %1005 = vst.msk [vmem:[%s1408_s7 + $0x250] sm:$0xff] %vm260_vm0, %v768_v61 }
 0x21f   : > { %1021 = vst.msk [vmem:[%s1408_s7 + $0x2d0] sm:$0xff] %vm260_vm0, %v784_v62 }
 0x221   : > { %v559_v22 = vpop.trf.xlu0 }
 0x222   : > { %v596_v63 = vadd.f32 %v1410_v23, %v559_v22 }
 0x223   : > { %v716_v0 = vpop.trf.xlu1 }
 0x224   : > { %v748_v1 = vpop.trf.xlu2  ;;  %986 = vst.msk [vmem:[%s1408_s7 + $0x1d8] sm:$0xff] %vm260_vm0, %v596_v63  ;;  %v769_v2 = vadd.f32 %v1556_v58, %v716_v0 }
 0x225   : > { %v785_v3 = vadd.f32 %v1556_v58, %v748_v1 }
 0x226   : > { %1006 = vst.msk [vmem:[%s1408_s7 + $0x258] sm:$0xff] %vm260_vm0, %v769_v2 }
 0x227   : > { %1022 = vst.msk [vmem:[%s1408_s7 + $0x2d8] sm:$0xff] %vm260_vm0, %v785_v3 }
 0x229   : > { %v560_v4 = vpop.trf.xlu0 }
 0x22a   : > { %v597_v5 = vadd.f32 %v1410_v23, %v560_v4 }
 0x22b   : > { %v717_v6 = vpop.trf.xlu1 }
 0x22c   : > { %v749_v7 = vpop.trf.xlu2  ;;  %987 = vst.msk [vmem:[%s1408_s7 + $0x1e0] sm:$0xff] %vm260_vm0, %v597_v5  ;;  %v770_v8 = vadd.f32 %v1556_v58, %v717_v6 }
 0x22d   : > { %v786_v9 = vadd.f32 %v1556_v58, %v749_v7 }
 0x22e   : > { %1007 = vst.msk [vmem:[%s1408_s7 + $0x260] sm:$0xff] %vm260_vm0, %v770_v8 }
 0x22f   : > { %1023 = vst.msk [vmem:[%s1408_s7 + $0x2e0] sm:$0xff] %vm260_vm0, %v786_v9 }
 0x231   : > { %v561_v10 = vpop.trf.xlu0 }
 0x232   : > { %v598_v11 = vadd.f32 %v1410_v23, %v561_v10 }
 0x233   : > { %v718_v12 = vpop.trf.xlu1 }
 0x234   : > { %v750_v13 = vpop.trf.xlu2  ;;  %988 = vst.msk [vmem:[%s1408_s7 + $0x1e8] sm:$0xff] %vm260_vm0, %v598_v11  ;;  %v771_v14 = vadd.f32 %v1556_v58, %v718_v12 }
 0x235   : > { %v787_v15 = vadd.f32 %v1556_v58, %v750_v13 }
 0x236   : > { %1008 = vst.msk [vmem:[%s1408_s7 + $0x268] sm:$0xff] %vm260_vm0, %v771_v14 }
 0x237   : > { %1024 = vst.msk [vmem:[%s1408_s7 + $0x2e8] sm:$0xff] %vm260_vm0, %v787_v15 }
 0x239   : > { %v562_v16 = vpop.trf.xlu0 }
 0x23a   : > { %v599_v17 = vadd.f32 %v1410_v23, %v562_v16 }
 0x23b   : > { %v719_v18 = vpop.trf.xlu1 }
 0x23c   : > { %v751_v19 = vpop.trf.xlu2  ;;  %989 = vst.msk [vmem:[%s1408_s7 + $0x1f0] sm:$0xff] %vm260_vm0, %v599_v17  ;;  %v772_v20 = vadd.f32 %v1556_v58, %v719_v18 }
 0x23d   : > { %v788_v21 = vadd.f32 %v1556_v58, %v751_v19 }
 0x23e   : > { %1009 = vst.msk [vmem:[%s1408_s7 + $0x270] sm:$0xff] %vm260_vm0, %v772_v20 }
 0x23f   : > { %1025 = vst.msk [vmem:[%s1408_s7 + $0x2f0] sm:$0xff] %vm260_vm0, %v788_v21 }
 0x241   : > { %v563_v24 = vpop.trf.xlu0 }
 0x242   : > { %v600_v25 = vadd.f32 %v1410_v23, %v563_v24 }
 0x243   : > { %v720_v26 = vpop.trf.xlu1 }
 0x244   : > { %v752_v27 = vpop.trf.xlu2  ;;  %990 = vst.msk [vmem:[%s1408_s7 + $0x1f8] sm:$0xff] %vm260_vm0, %v600_v25  ;;  %v773_v28 = vadd.f32 %v1556_v58, %v720_v26 }
 0x245   : > { %v789_v29 = vadd.f32 %v1556_v58, %v752_v27 }
 0x246   : > { %1010 = vst.msk [vmem:[%s1408_s7 + $0x278] sm:$0xff] %vm260_vm0, %v773_v28 }
 0x247   : > { %1026 = vst.msk [vmem:[%s1408_s7 + $0x2f8] sm:$0xff] %vm260_vm0, %v789_v29 }
 0x248 PF: > { %s17_s17 = sadd.s32 1, %s1264_s17   ;;  %s1728_s12 = smov %s1248_s13 }
 0x249   : > { %p14_p2 = scmp.ge.s32.totalorder %s17_s17, 4   ;;  %s1729_s13 = smov %s1252_s14 }
 0x24a   : > { %s1730_s14 = smov %s1368_s23  ;;  %s1731_s15 = smov %s1260_s16 }
 0x24b   : > { %s1732_s16 = smov %s1734_s9  ;;  %16 = sbr.rel (!%p14_p2) target bundleno = 5 (0x5), region = 86 }
 0x250   :  { %853 = vsyncpa [#allocation3], 1 }
 0x251   :  { %855 = vsyncpa [#allocation3 + $0x1], 1 }
 0x252   :  { %856 = vsyncpa [#allocation5], 1 }

// kernel: tpu_custom_call.1
= control target key start
LH: loop header
LB: loop body
LE: loop exit
PB: predicated region body
PF: predicated region fallthrough
CT: control target
= control target key end

     0   :  { %8 = vsyncpa [#allocation3], 0  ;;  %s1720_s0 = inlined_call_operand.hbm [shape: f32[2,16,256], index: 0, kind: input, shape index: {}]   ;;  %s1721_s1 = inlined_call_operand.hbm [shape: f32[3,16,16], index: 1, kind: input, shape index: {}]   ;;  %s1722_s2 = inlined_call_operand.hbm [shape: f32[3,1,16], index: 2, kind: input, shape index: {}]   ;;  %s1723_s3 = inlined_call_operand.vmem [shape: f32[2,3,256,16], index: 3, kind: output, shape index: {}]  }
   0x1   :  { %10 = vsyncpa [#allocation3 + $0x1], 0 }
   0x2   :  { %11 = vsyncpa [#allocation5], 0  ;;  %s1293_s12 = smov 0   ;;  %s1295_s13 = smov 0  }
   0x3   :  { %s1297_s14 = smov 0   ;;  %s1299_s15 = smov 0  }
   0x4   :  { %s1301_s16 = smov 0   ;;  %s1303_s17 = smov 0  }
   0x5 LB: > { %s937_s18 = sadd.s32 4294967295, %s1264_s17   ;;  %p51_p0 = scmp.ne.s32.totalorder %s1248_s13, %s1244_s12  ;;  %s1264_s17 = sphi %s1303_s17, %s17_s17   ;;  %s1260_s16 = sphi %s1301_s16, %s1732_s16   ;;  %s1256_s15 = sphi %s1299_s15, %s1731_s15   ;;  %s1252_s14 = sphi %s1297_s14, %s1730_s14   ;;  %s1248_s13 = sphi %s1295_s13, %s1729_s13   ;;  %s1244_s12 = sphi %s1293_s12, %s1728_s12  }
   0x6   : > { %p1323_p1 = scmp.eq.s32.totalorder %s937_s18, 0  ;;  %p939_p2 = scmp.ge.s32.totalorder %s1264_s17, 1 }
   0x7   : > { %p132_p3 = scmp.lt.s32.totalorder %s1264_s17, 3  ;;  %s143_s23 = sshll.u32 %s1721_s1, 4  ;;  %s144_s23 = int_to_ptr.hbm [resolvable:$true] %s143_s23 }
   0x8   : > { %p1331_p4 = por %p1323_p1, %p51_p0  ;;  %s1266_s25 = smov [#allocation4]  }
   0x9   : > { %p1338_p5 = pnand %p939_p2, %p132_p3  ;;  %s145_s26 = sshll.u32 %s1266_s25, 4  ;;  %s146_s26 = int_to_ptr.vmem [resolvable:$true] %s145_s26 }
   0xa   : > { %s157_s29 = sshll.u32 %s1722_s2, 4  ;;  %s1267_s30 = smov 128   ;;  %s158_s29 = int_to_ptr.hbm [resolvable:$true] %s157_s29 }
   0xb   : > { %p1045_p6 = pneg %p1338_p5  ;;  %s1268_s4 = smov 8  }
   0xc   : > { %s1269_s5 = smov [#allocation6]   ;;  %s1270_s7 = smov 16  }
   0xd   : > { %p1046_p7 = pnand %p1045_p6, %p1323_p1  ;;  %s159_s6 = sshll.u32 %s1269_s5, 4  ;;  %s160_s6 = int_to_ptr.vmem [resolvable:$true] %s159_s6 }
   0xe   : > { %s1271_s8 = smov 1   ;;  %s29_s9 = sadd.s32 1, %s1260_s16 }
   0xf   : > { %1048 = dma.hbm_to_vmem [thread:$0]  (!%p1046_p7), %s144_s23, 768, %s146_s26, [#allocation5], %s1267_s30, %s1267_s30, %s1268_s4  }
  0x10   : > { %1051 = dma.hbm_to_vmem [thread:$0]  (!%p1046_p7), %s158_s29, 48, %s160_s6, [#allocation5], %s1270_s7, %s1270_s7, %s1271_s8  }
  0x11   : > { %s38_s10 = sadd.s32 1, %s1252_s14  ;;  %p31_p8 = scmp.ge.s32.totalorder %s29_s9, 2 }
  0x12   : > { %p45_p9 = scmp.ne.s32.totalorder %s1252_s14, %s1248_s13  ;;  %p46_p10 = scmp.eq.s32.totalorder %s1264_s17, 0 }
  0x13   : > { %p1058_p11 = scmp.lt.s32.totalorder %s1264_s17, 2  ;;  %s1734_s9 = smov (%p31_p8, %s29_s9), 0 }
  0x14   : > { %p1359_p12 = por %p46_p10, %p45_p9  ;;  %s173_s12 = sand.u32 1, %s1252_s14  }
  0x15   : > { %s33_s18 = ssub.s32 %s1260_s16, %s1734_s9  ;;  %s943_s21 = sshll.u32 %s173_s12, 5 }
  0x16   : > { %p36_p13 = scmp.eq.s32.totalorder %s33_s18, 0  ;;  %s1029_s22 = sshll.u32 %s1260_s16, 5 }
  0x17   : > { %s184_s27 = scalar_lea.hbm %s1720_s0, %s1029_s22  ;;  %s177_s28 = scalar_lea.vmem [#allocation2], %s943_s21 }
  0x18   : > { %s1368_s23 = scalar_select %p36_p13, %s1252_s14, %s38_s10  }
  0x19   : > { %s187_s29 = sshll.u32 %s177_s28, 4  ;;  %s185_s30 = sshll.u32 %s184_s27, 4  ;;  %s188_s29 = int_to_ptr.vmem [resolvable:$true] %s187_s29  ;;  %s186_s30 = int_to_ptr.hbm [resolvable:$true] %s185_s30 }
  0x1a   : > { %p1053_p0 = pnand %p1058_p11, %p1359_p12  ;;  %s174_s4 = scalar_lea.sflag [#allocation3], %s173_s12 }
  0x1b   : > { %s1272_s5 = smov 256   ;;  %199 = sbr.rel (%p1338_p5) target bundleno = 584 (0x248), region = 32 }
  0x1c   : > { %1055 = dma.hbm_to_vmem [thread:$0]  (!%p1053_p0), %s186_s30, 512, %s188_s29, %s174_s4, %s1272_s5, %s1272_s5, %s1270_s7  }
  0x1d   : > { %s201_s6 = sand.u32 (!%p1338_p5), 1, %s1248_s13  }
  0x1e   : > { %s947_s8 = sshll.u32 (!%p1338_p5), %s201_s6, 5  ;;  %s202_s10 = scalar_lea.sflag (!%p1338_p5), [#allocation3], %s201_s6 }
  0x1f   : > { %s205_s18 = scalar_lea.vmem (!%p1338_p5), [#allocation2], %s947_s8 }
  0x20   : > { %1235 = dma.done.wait (%p1331_p4), %s202_s10, 512  }
  0x21   : > { %1237 = vsyncadd (%p1331_p4), %s202_s10, 4294966784 }
  0x22   : > { %1239 = dma.done.wait (%p1323_p1), [#allocation5], 816  }
  0x23   : > { %1241 = vsyncadd (%p1323_p1), [#allocation5], 4294966480  ;;  %v256_v0 = vld [vmem:[%s205_s18 + $0x10] sm:$0xff]  ;;  %v254_v1 = vld [vmem:[%s205_s18] sm:$0xff]  ;;  %vm260_vm0 = vcmask 130048   ;;  %p245_p1 = scmp.lt.s32.totalorder %s1256_s15, 1 }
  0x24   : > { %281 = vmatpush.msra.mxu0 %v256_v0  ;;  %1030 = vmatpush.msra.mxu2 %v256_v0  ;;  %v258_v2 = vld [vmem:[#allocation4] sm:$0xff]  ;;  %v259_v3 = vld [vmem:[#allocation4 + $0x8] sm:$0xff]  ;;  %v257_v4 = vld [vmem:[%s205_s18 + $0x18] sm:$0xff] }
  0x25   : > { %304 = vmatpush.msra.mxu1 %v257_v4  ;;  %1032 = vmatpush.msra.mxu3 %v257_v4  ;;  %v255_v5 = vld [vmem:[%s205_s18 + $0x8] sm:$0xff]  ;;  %v446_v6 = vld [vmem:[#allocation4 + $0x10] sm:$0xff]  ;;  %v447_v7 = vld [vmem:[#allocation4 + $0x18] sm:$0xff]  ;;  %s1736_s15 = smov (!%p245_p1, %s1256_s15), 1 }
  0x26   : > { %282 = vmatpush.msra.mxu0 %v254_v1  ;;  %1031 = vmatpush.msra.mxu2 %v254_v1  ;;  %v635_v8 = vld [vmem:[#allocation4 + $0x20] sm:$0xff]  ;;  %v636_v9 = vld [vmem:[#allocation4 + $0x28] sm:$0xff]  ;;  %s1034_s19 = smul.u32 768, %s1736_s15  ;;  %v1403_v22 = vld [vmem:[#allocation6] ss:$0 sm:$0xff] }
  0x27   : > { %951 = vmatmul.msk.f32.vlgmr.msra.gmra.mxu0 %vm260_vm0, %v258_v2  ;;  %952 = vmatmul.msk.f32.vlgmr.msra.gmra.mxu2 %vm260_vm0, %v259_v3  ;;  %v1410_v23 = vld [vmem:[#allocation6 + $0x1] ss:$0 sm:$0xff] }
  0x28   : > { %468 = vmatpush.msrb.mxu2 %v256_v0  ;;  %305 = vmatpush.msra.mxu1 %v255_v5  ;;  %s1408_s7 = scalar_lea.vmem %s1723_s3, %s1034_s19 }
  0x29   : > { %953 = vmatmul.msk.f32.vlgmr.msra.gmra.mxu1 %vm260_vm0, %v258_v2  ;;  %1033 = vmatpush.msra.mxu3 %v255_v5 }
  0x2a   : > { %469 = vmatpush.msrb.mxu2 %v254_v1  ;;  %954 = vmatmul.msk.f32.vlgmr.msra.gmra.mxu3 %vm260_vm0, %v259_v3 }
  0x2b   : > { %491 = vmatpush.msrb.mxu3 %v257_v4  ;;  %657 = vmatpush.msrb.mxu0 %v256_v0 }
  0x2c   : > { %680 = vmatpush.msrb.mxu1 %v257_v4 }
  0x2d   : > { %492 = vmatpush.msrb.mxu3 %v255_v5  ;;  %658 = vmatpush.msrb.mxu0 %v254_v1 }
  0x2e   : > { %681 = vmatpush.msrb.mxu1 %v255_v5 }
  0x2f   : > { %955 = vmatmul.msk.f32.vlgmr.msrb.gmra.mxu2 %vm260_vm0, %v446_v6  ;;  %991 = vmatmul.msk.f32.vlgmr.msrb.gmra.mxu0 %vm260_vm0, %v635_v8 }
  0x31   : > { %993 = vmatmul.msk.f32.vlgmr.msrb.gmra.mxu1 %vm260_vm0, %v635_v8 }
  0x32   : > { %957 = vmatmul.msk.f32.vlgmr.msrb.gmra.mxu3 %vm260_vm0, %v446_v6 }
  0x37   : > { %956 = vmatmul.msk.f32.gmra.mxu2 %vm260_vm0, %v447_v7  ;;  %992 = vmatmul.msk.f32.gmra.mxu0 %vm260_vm0, %v636_v9 }
  0x39   : > { %994 = vmatmul.msk.f32.gmra.mxu1 %vm260_vm0, %v636_v9 }
  0x3a   : > { %958 = vmatmul.msk.f32.gmra.mxu3 %vm260_vm0, %v447_v7 }
  0xa4   : > { %v284_v10 = vpop.f32.mrf.mxu0 }
  0xa5   : > { %313 = vxpose.xlu0.b32.start [1/2] (short) %v284_v10, 128 }
  0xa6   : > { %v307_v11 = vpop.f32.mrf.mxu1 }
  0xa7   : > { %345 = vxpose.xlu1.b32.start [1/2] (short) %v307_v11, 128 }
  0xaa   : > { %v287_v12 = vpop.f32.mrf.mxu2 }
  0xac   : > { %v660_v17 = vpop.f32.mrf.mxu0 }
  0xad   : > { %314 = vxpose.xlu0.b32.end [2/2] (short) %v287_v12, 128  ;;  %v310_v13 = vpop.f32.mrf.mxu3 }
  0xae   : > { %v683_v20 = vpop.f32.mrf.mxu1 }
  0xaf   : > { %346 = vxpose.xlu1.b32.end [2/2] (short) %v310_v13, 128 }
  0xb2   : > { %v471_v14 = vpop.f32.mrf.mxu2 }
  0xb3   : > { %500 = vxpose.xlu2.b32.start [1/2] (short) %v471_v14, 128 }
  0xb4   : > { %v663_v19 = vpop.f32.mrf.mxu0 }
  0xb5   : > { %v494_v16 = vpop.f32.mrf.mxu3 }
  0xb6   : > { %v686_v21 = vpop.f32.mrf.mxu1 }
  0xba   : > { %v474_v15 = vpop.f32.mrf.mxu2 }
  0xbb   : > { %501 = vxpose.xlu2.b32.end [2/2] (short) %v474_v15, 128 }
  0xbd   : > { %v497_v18 = vpop.f32.mrf.mxu3 }
 0x125   : > { %532 = vxpose.xlu0.b32.start [1/2] (short) %v494_v16, 128 }
 0x127   : > { %689 = vxpose.xlu1.b32.start [1/2] (short) %v660_v17, 128 }
 0x12d   : > { %533 = vxpose.xlu0.b32.end [2/2] (short) %v497_v18, 128 }
 0x12f   : > { %690 = vxpose.xlu1.b32.end [2/2] (short) %v663_v19, 128 }
 0x133   : > { %721 = vxpose.xlu2.b32.start [1/2] (short) %v683_v20, 128 }
 0x13b   : > { %722 = vxpose.xlu2.b32.end [2/2] (short) %v686_v21, 128 }
 0x149   : > { %v329_v24 = vpop.trf.xlu0 }
 0x14a   : > { %v381_v25 = vadd.f32 %v1403_v22, %v329_v24 }
 0x14b   : > { %v361_v26 = vpop.trf.xlu1 }
 0x14c   : > { %v397_v27 = vadd.f32 %v1403_v22, %v361_v26  ;;  %v516_v28 = vpop.trf.xlu2  ;;  %413 = vst.msk [vmem:[%s1408_s7] sm:$0xff] %vm260_vm0, %v381_v25 }
 0x14d   : > { %v569_v29 = vadd.f32 %v1410_v23, %v516_v28 }
 0x14e   : > { %429 = vst.msk [vmem:[%s1408_s7 + $0x80] sm:$0xff] %vm260_vm0, %v397_v27 }
 0x14f   : > { %959 = vst.msk [vmem:[%s1408_s7 + $0x100] sm:$0xff] %vm260_vm0, %v569_v29 }
 0x151   : > { %v330_v30 = vpop.trf.xlu0 }
 0x152   : > { %v382_v31 = vadd.f32 %v1403_v22, %v330_v30 }
 0x153   : > { %v362_v32 = vpop.trf.xlu1 }
 0x154   : > { %v398_v33 = vadd.f32 %v1403_v22, %v362_v32  ;;  %v517_v34 = vpop.trf.xlu2  ;;  %414 = vst.msk [vmem:[%s1408_s7 + $0x8] sm:$0xff] %vm260_vm0, %v382_v31 }
 0x155   : > { %v570_v35 = vadd.f32 %v1410_v23, %v517_v34 }
 0x156   : > { %430 = vst.msk [vmem:[%s1408_s7 + $0x88] sm:$0xff] %vm260_vm0, %v398_v33 }
 0x157   : > { %960 = vst.msk [vmem:[%s1408_s7 + $0x108] sm:$0xff] %vm260_vm0, %v570_v35 }
 0x159   : > { %v331_v36 = vpop.trf.xlu0 }
 0x15a   : > { %v383_v37 = vadd.f32 %v1403_v22, %v331_v36 }
 0x15b   : > { %v363_v38 = vpop.trf.xlu1 }
 0x15c   : > { %v399_v39 = vadd.f32 %v1403_v22, %v363_v38  ;;  %v518_v40 = vpop.trf.xlu2  ;;  %415 = vst.msk [vmem:[%s1408_s7 + $0x10] sm:$0xff] %vm260_vm0, %v383_v37 }
 0x15d   : > { %v571_v41 = vadd.f32 %v1410_v23, %v518_v40 }
 0x15e   : > { %431 = vst.msk [vmem:[%s1408_s7 + $0x90] sm:$0xff] %vm260_vm0, %v399_v39 }
 0x15f   : > { %961 = vst.msk [vmem:[%s1408_s7 + $0x110] sm:$0xff] %vm260_vm0, %v571_v41 }
 0x161   : > { %v332_v42 = vpop.trf.xlu0 }
 0x162   : > { %v384_v43 = vadd.f32 %v1403_v22, %v332_v42 }
 0x163   : > { %v364_v44 = vpop.trf.xlu1 }
 0x164   : > { %v400_v45 = vadd.f32 %v1403_v22, %v364_v44  ;;  %v519_v46 = vpop.trf.xlu2  ;;  %416 = vst.msk [vmem:[%s1408_s7 + $0x18] sm:$0xff] %vm260_vm0, %v384_v43 }
 0x165   : > { %v572_v47 = vadd.f32 %v1410_v23, %v519_v46 }
 0x166   : > { %432 = vst.msk [vmem:[%s1408_s7 + $0x98] sm:$0xff] %vm260_vm0, %v400_v45 }
 0x167   : > { %962 = vst.msk [vmem:[%s1408_s7 + $0x118] sm:$0xff] %vm260_vm0, %v572_v47 }
 0x169   : > { %v333_v48 = vpop.trf.xlu0 }
 0x16a   : > { %v385_v49 = vadd.f32 %v1403_v22, %v333_v48 }
 0x16b   : > { %v365_v50 = vpop.trf.xlu1 }
 0x16c   : > { %v401_v51 = vadd.f32 %v1403_v22, %v365_v50  ;;  %v520_v52 = vpop.trf.xlu2  ;;  %417 = vst.msk [vmem:[%s1408_s7 + $0x20] sm:$0xff] %vm260_vm0, %v385_v49 }
 0x16d   : > { %v573_v53 = vadd.f32 %v1410_v23, %v520_v52 }
 0x16e   : > { %433 = vst.msk [vmem:[%s1408_s7 + $0xa0] sm:$0xff] %vm260_vm0, %v401_v51 }
 0x16f   : > { %963 = vst.msk [vmem:[%s1408_s7 + $0x120] sm:$0xff] %vm260_vm0, %v573_v53 }
 0x171   : > { %v334_v54 = vpop.trf.xlu0 }
 0x172   : > { %v386_v55 = vadd.f32 %v1403_v22, %v334_v54 }
 0x173   : > { %v366_v56 = vpop.trf.xlu1 }
 0x174   : > { %v402_v57 = vadd.f32 %v1403_v22, %v366_v56  ;;  %v521_v58 = vpop.trf.xlu2  ;;  %418 = vst.msk [vmem:[%s1408_s7 + $0x28] sm:$0xff] %vm260_vm0, %v386_v55 }
 0x175   : > { %v574_v59 = vadd.f32 %v1410_v23, %v521_v58  ;;  %v1556_v58 = vld [vmem:[#allocation6 + $0x2] ss:$0 sm:$0xff] }
 0x176   : > { %434 = vst.msk [vmem:[%s1408_s7 + $0xa8] sm:$0xff] %vm260_vm0, %v402_v57 }
 0x177   : > { %964 = vst.msk [vmem:[%s1408_s7 + $0x128] sm:$0xff] %vm260_vm0, %v574_v59 }
 0x179   : > { %v335_v60 = vpop.trf.xlu0 }
 0x17a   : > { %v387_v61 = vadd.f32 %v1403_v22, %v335_v60 }
 0x17b   : > { %v367_v62 = vpop.trf.xlu1 }
 0x17c   : > { %v403_v63 = vadd.f32 %v1403_v22, %v367_v62  ;;  %v522_v0 = vpop.trf.xlu2  ;;  %419 = vst.msk [vmem:[%s1408_s7 + $0x30] sm:$0xff] %vm260_vm0, %v387_v61 }
 0x17d   : > { %v575_v1 = vadd.f32 %v1410_v23, %v522_v0 }
 0x17e   : > { %435 = vst.msk [vmem:[%s1408_s7 + $0xb0] sm:$0xff] %vm260_vm0, %v403_v63 }
 0x17f   : > { %965 = vst.msk [vmem:[%s1408_s7 + $0x130] sm:$0xff] %vm260_vm0, %v575_v1 }
 0x181   : > { %v336_v2 = vpop.trf.xlu0 }
 0x182   : > { %v388_v3 = vadd.f32 %v1403_v22, %v336_v2 }
 0x183   : > { %v368_v4 = vpop.trf.xlu1 }
 0x184   : > { %v404_v5 = vadd.f32 %v1403_v22, %v368_v4  ;;  %v523_v6 = vpop.trf.xlu2  ;;  %420 = vst.msk [vmem:[%s1408_s7 + $0x38] sm:$0xff] %vm260_vm0, %v388_v3 }
 0x185   : > { %v576_v7 = vadd.f32 %v1410_v23, %v523_v6 }
 0x186   : > { %436 = vst.msk [vmem:[%s1408_s7 + $0xb8] sm:$0xff] %vm260_vm0, %v404_v5 }
 0x187   : > { %966 = vst.msk [vmem:[%s1408_s7 + $0x138] sm:$0xff] %vm260_vm0, %v576_v7 }
 0x189   : > { %v337_v8 = vpop.trf.xlu0 }
 0x18a   : > { %v389_v9 = vadd.f32 %v1403_v22, %v337_v8 }
 0x18b   : > { %v369_v10 = vpop.trf.xlu1 }
 0x18c   : > { %v405_v11 = vadd.f32 %v1403_v22, %v369_v10  ;;  %v524_v12 = vpop.trf.xlu2  ;;  %421 = vst.msk [vmem:[%s1408_s7 + $0x40] sm:$0xff] %vm260_vm0, %v389_v9 }
 0x18d   : > { %v577_v13 = vadd.f32 %v1410_v23, %v524_v12 }
 0x18e   : > { %437 = vst.msk [vmem:[%s1408_s7 + $0xc0] sm:$0xff] %vm260_vm0, %v405_v11 }
 0x18f   : > { %967 = vst.msk [vmem:[%s1408_s7 + $0x140] sm:$0xff] %vm260_vm0, %v577_v13 }
 0x191   : > { %v338_v14 = vpop.trf.xlu0 }
 0x192   : > { %v390_v15 = vadd.f32 %v1403_v22, %v338_v14 }
 0x193   : > { %v370_v16 = vpop.trf.xlu1 }
 0x194   : > { %v406_v17 = vadd.f32 %v1403_v22, %v370_v16  ;;  %v525_v18 = vpop.trf.xlu2  ;;  %422 = vst.msk [vmem:[%s1408_s7 + $0x48] sm:$0xff] %vm260_vm0, %v390_v15 }
 0x195   : > { %v578_v19 = vadd.f32 %v1410_v23, %v525_v18 }
 0x196   : > { %438 = vst.msk [vmem:[%s1408_s7 + $0xc8] sm:$0xff] %vm260_vm0, %v406_v17 }
 0x197   : > { %968 = vst.msk [vmem:[%s1408_s7 + $0x148] sm:$0xff] %vm260_vm0, %v578_v19 }
 0x199   : > { %v339_v20 = vpop.trf.xlu0 }
 0x19a   : > { %v391_v21 = vadd.f32 %v1403_v22, %v339_v20 }
 0x19b   : > { %v371_v24 = vpop.trf.xlu1 }
 0x19c   : > { %v407_v25 = vadd.f32 %v1403_v22, %v371_v24  ;;  %v526_v26 = vpop.trf.xlu2  ;;  %423 = vst.msk [vmem:[%s1408_s7 + $0x50] sm:$0xff] %vm260_vm0, %v391_v21 }
 0x19d   : > { %v579_v27 = vadd.f32 %v1410_v23, %v526_v26 }
 0x19e   : > { %439 = vst.msk [vmem:[%s1408_s7 + $0xd0] sm:$0xff] %vm260_vm0, %v407_v25 }
 0x19f   : > { %969 = vst.msk [vmem:[%s1408_s7 + $0x150] sm:$0xff] %vm260_vm0, %v579_v27 }
 0x1a1   : > { %v340_v28 = vpop.trf.xlu0 }
 0x1a2   : > { %v392_v29 = vadd.f32 %v1403_v22, %v340_v28 }
 0x1a3   : > { %v372_v30 = vpop.trf.xlu1 }
 0x1a4   : > { %v408_v31 = vadd.f32 %v1403_v22, %v372_v30  ;;  %v527_v32 = vpop.trf.xlu2  ;;  %424 = vst.msk [vmem:[%s1408_s7 + $0x58] sm:$0xff] %vm260_vm0, %v392_v29 }
 0x1a5   : > { %v580_v33 = vadd.f32 %v1410_v23, %v527_v32 }
 0x1a6   : > { %440 = vst.msk [vmem:[%s1408_s7 + $0xd8] sm:$0xff] %vm260_vm0, %v408_v31 }
 0x1a7   : > { %970 = vst.msk [vmem:[%s1408_s7 + $0x158] sm:$0xff] %vm260_vm0, %v580_v33 }
 0x1a9   : > { %v341_v34 = vpop.trf.xlu0 }
 0x1aa   : > { %v393_v35 = vadd.f32 %v1403_v22, %v341_v34 }
 0x1ab   : > { %v373_v36 = vpop.trf.xlu1 }
 0x1ac   : > { %v409_v37 = vadd.f32 %v1403_v22, %v373_v36  ;;  %v528_v38 = vpop.trf.xlu2  ;;  %425 = vst.msk [vmem:[%s1408_s7 + $0x60] sm:$0xff] %vm260_vm0, %v393_v35 }
 0x1ad   : > { %v581_v39 = vadd.f32 %v1410_v23, %v528_v38 }
 0x1ae   : > { %441 = vst.msk [vmem:[%s1408_s7 + $0xe0] sm:$0xff] %vm260_vm0, %v409_v37 }
 0x1af   : > { %971 = vst.msk [vmem:[%s1408_s7 + $0x160] sm:$0xff] %vm260_vm0, %v581_v39 }
 0x1b1   : > { %v342_v40 = vpop.trf.xlu0 }
 0x1b2   : > { %v394_v41 = vadd.f32 %v1403_v22, %v342_v40 }
 0x1b3   : > { %v374_v42 = vpop.trf.xlu1 }
 0x1b4   : > { %v410_v43 = vadd.f32 %v1403_v22, %v374_v42  ;;  %v529_v44 = vpop.trf.xlu2  ;;  %426 = vst.msk [vmem:[%s1408_s7 + $0x68] sm:$0xff] %vm260_vm0, %v394_v41 }
 0x1b5   : > { %v582_v45 = vadd.f32 %v1410_v23, %v529_v44 }
 0x1b6   : > { %442 = vst.msk [vmem:[%s1408_s7 + $0xe8] sm:$0xff] %vm260_vm0, %v410_v43 }
 0x1b7   : > { %972 = vst.msk [vmem:[%s1408_s7 + $0x168] sm:$0xff] %vm260_vm0, %v582_v45 }
 0x1b9   : > { %v343_v46 = vpop.trf.xlu0 }
 0x1ba   : > { %v395_v47 = vadd.f32 %v1403_v22, %v343_v46 }
 0x1bb   : > { %v375_v48 = vpop.trf.xlu1 }
 0x1bc   : > { %v411_v49 = vadd.f32 %v1403_v22, %v375_v48  ;;  %v530_v50 = vpop.trf.xlu2  ;;  %427 = vst.msk [vmem:[%s1408_s7 + $0x70] sm:$0xff] %vm260_vm0, %v395_v47 }
 0x1bd   : > { %v583_v51 = vadd.f32 %v1410_v23, %v530_v50 }
 0x1be   : > { %443 = vst.msk [vmem:[%s1408_s7 + $0xf0] sm:$0xff] %vm260_vm0, %v411_v49 }
 0x1bf   : > { %973 = vst.msk [vmem:[%s1408_s7 + $0x170] sm:$0xff] %vm260_vm0, %v583_v51 }
 0x1c1   : > { %v344_v52 = vpop.trf.xlu0 }
 0x1c2   : > { %v396_v53 = vadd.f32 %v1403_v22, %v344_v52 }
 0x1c3   : > { %v376_v54 = vpop.trf.xlu1 }
 0x1c4   : > { %v412_v55 = vadd.f32 %v1403_v22, %v376_v54  ;;  %v531_v56 = vpop.trf.xlu2  ;;  %428 = vst.msk [vmem:[%s1408_s7 + $0x78] sm:$0xff] %vm260_vm0, %v396_v53 }
 0x1c5   : > { %v584_v57 = vadd.f32 %v1410_v23, %v531_v56 }
 0x1c6   : > { %444 = vst.msk [vmem:[%s1408_s7 + $0xf8] sm:$0xff] %vm260_vm0, %v412_v55 }
 0x1c7   : > { %974 = vst.msk [vmem:[%s1408_s7 + $0x178] sm:$0xff] %vm260_vm0, %v584_v57 }
 0x1c9   : > { %v548_v59 = vpop.trf.xlu0 }
 0x1ca   : > { %v585_v60 = vadd.f32 %v1410_v23, %v548_v59 }
 0x1cb   : > { %v705_v61 = vpop.trf.xlu1 }
 0x1cc   : > { %v737_v62 = vpop.trf.xlu2  ;;  %975 = vst.msk [vmem:[%s1408_s7 + $0x180] sm:$0xff] %vm260_vm0, %v585_v60  ;;  %v758_v22 = vadd.f32 %v1556_v58, %v705_v61 }
 0x1cd   : > { %v774_v63 = vadd.f32 %v1556_v58, %v737_v62 }
 0x1ce   : > { %995 = vst.msk [vmem:[%s1408_s7 + $0x200] sm:$0xff] %vm260_vm0, %v758_v22 }
 0x1cf   : > { %1011 = vst.msk [vmem:[%s1408_s7 + $0x280] sm:$0xff] %vm260_vm0, %v774_v63 }
 0x1d1   : > { %v549_v0 = vpop.trf.xlu0 }
 0x1d2   : > { %v586_v1 = vadd.f32 %v1410_v23, %v549_v0 }
 0x1d3   : > { %v706_v2 = vpop.trf.xlu1 }
 0x1d4   : > { %v738_v3 = vpop.trf.xlu2  ;;  %976 = vst.msk [vmem:[%s1408_s7 + $0x188] sm:$0xff] %vm260_vm0, %v586_v1  ;;  %v759_v4 = vadd.f32 %v1556_v58, %v706_v2 }
 0x1d5   : > { %v775_v5 = vadd.f32 %v1556_v58, %v738_v3 }
 0x1d6   : > { %996 = vst.msk [vmem:[%s1408_s7 + $0x208] sm:$0xff] %vm260_vm0, %v759_v4 }
 0x1d7   : > { %1012 = vst.msk [vmem:[%s1408_s7 + $0x288] sm:$0xff] %vm260_vm0, %v775_v5 }
 0x1d9   : > { %v550_v6 = vpop.trf.xlu0 }
 0x1da   : > { %v587_v7 = vadd.f32 %v1410_v23, %v550_v6 }
 0x1db   : > { %v707_v8 = vpop.trf.xlu1 }
 0x1dc   : > { %v739_v9 = vpop.trf.xlu2  ;;  %977 = vst.msk [vmem:[%s1408_s7 + $0x190] sm:$0xff] %vm260_vm0, %v587_v7  ;;  %v760_v10 = vadd.f32 %v1556_v58, %v707_v8 }
 0x1dd   : > { %v776_v11 = vadd.f32 %v1556_v58, %v739_v9 }
 0x1de   : > { %997 = vst.msk [vmem:[%s1408_s7 + $0x210] sm:$0xff] %vm260_vm0, %v760_v10 }
 0x1df   : > { %1013 = vst.msk [vmem:[%s1408_s7 + $0x290] sm:$0xff] %vm260_vm0, %v776_v11 }
 0x1e1   : > { %v551_v12 = vpop.trf.xlu0 }
 0x1e2   : > { %v588_v13 = vadd.f32 %v1410_v23, %v551_v12 }
 0x1e3   : > { %v708_v14 = vpop.trf.xlu1 }
 0x1e4   : > { %v740_v15 = vpop.trf.xlu2  ;;  %978 = vst.msk [vmem:[%s1408_s7 + $0x198] sm:$0xff] %vm260_vm0, %v588_v13  ;;  %v761_v16 = vadd.f32 %v1556_v58, %v708_v14 }
 0x1e5   : > { %v777_v17 = vadd.f32 %v1556_v58, %v740_v15 }
 0x1e6   : > { %998 = vst.msk [vmem:[%s1408_s7 + $0x218] sm:$0xff] %vm260_vm0, %v761_v16 }
 0x1e7   : > { %1014 = vst.msk [vmem:[%s1408_s7 + $0x298] sm:$0xff] %vm260_vm0, %v777_v17 }
 0x1e9   : > { %v552_v18 = vpop.trf.xlu0 }
 0x1ea   : > { %v589_v19 = vadd.f32 %v1410_v23, %v552_v18 }
 0x1eb   : > { %v709_v20 = vpop.trf.xlu1 }
 0x1ec   : > { %v741_v21 = vpop.trf.xlu2  ;;  %979 = vst.msk [vmem:[%s1408_s7 + $0x1a0] sm:$0xff] %vm260_vm0, %v589_v19  ;;  %v762_v24 = vadd.f32 %v1556_v58, %v709_v20 }
 0x1ed   : > { %v778_v25 = vadd.f32 %v1556_v58, %v741_v21 }
 0x1ee   : > { %999 = vst.msk [vmem:[%s1408_s7 + $0x220] sm:$0xff] %vm260_vm0, %v762_v24 }
 0x1ef   : > { %1015 = vst.msk [vmem:[%s1408_s7 + $0x2a0] sm:$0xff] %vm260_vm0, %v778_v25 }
 0x1f1   : > { %v553_v26 = vpop.trf.xlu0 }
 0x1f2   : > { %v590_v27 = vadd.f32 %v1410_v23, %v553_v26 }
 0x1f3   : > { %v710_v28 = vpop.trf.xlu1 }
 0x1f4   : > { %v742_v29 = vpop.trf.xlu2  ;;  %980 = vst.msk [vmem:[%s1408_s7 + $0x1a8] sm:$0xff] %vm260_vm0, %v590_v27  ;;  %v763_v30 = vadd.f32 %v1556_v58, %v710_v28 }
 0x1f5   : > { %v779_v31 = vadd.f32 %v1556_v58, %v742_v29 }
 0x1f6   : > { %1000 = vst.msk [vmem:[%s1408_s7 + $0x228] sm:$0xff] %vm260_vm0, %v763_v30 }
 0x1f7   : > { %1016 = vst.msk [vmem:[%s1408_s7 + $0x2a8] sm:$0xff] %vm260_vm0, %v779_v31 }
 0x1f9   : > { %v554_v32 = vpop.trf.xlu0 }
 0x1fa   : > { %v591_v33 = vadd.f32 %v1410_v23, %v554_v32 }
 0x1fb   : > { %v711_v34 = vpop.trf.xlu1 }
 0x1fc   : > { %v743_v35 = vpop.trf.xlu2  ;;  %981 = vst.msk [vmem:[%s1408_s7 + $0x1b0] sm:$0xff] %vm260_vm0, %v591_v33  ;;  %v764_v36 = vadd.f32 %v1556_v58, %v711_v34 }
 0x1fd   : > { %v780_v37 = vadd.f32 %v1556_v58, %v743_v35 }
 0x1fe   : > { %1001 = vst.msk [vmem:[%s1408_s7 + $0x230] sm:$0xff] %vm260_vm0, %v764_v36 }
 0x1ff   : > { %1017 = vst.msk [vmem:[%s1408_s7 + $0x2b0] sm:$0xff] %vm260_vm0, %v780_v37 }
 0x201   : > { %v555_v38 = vpop.trf.xlu0 }
 0x202   : > { %v592_v39 = vadd.f32 %v1410_v23, %v555_v38 }
 0x203   : > { %v712_v40 = vpop.trf.xlu1 }
 0x204   : > { %v744_v41 = vpop.trf.xlu2  ;;  %982 = vst.msk [vmem:[%s1408_s7 + $0x1b8] sm:$0xff] %vm260_vm0, %v592_v39  ;;  %v765_v42 = vadd.f32 %v1556_v58, %v712_v40 }
 0x205   : > { %v781_v43 = vadd.f32 %v1556_v58, %v744_v41 }
 0x206   : > { %1002 = vst.msk [vmem:[%s1408_s7 + $0x238] sm:$0xff] %vm260_vm0, %v765_v42 }
 0x207   : > { %1018 = vst.msk [vmem:[%s1408_s7 + $0x2b8] sm:$0xff] %vm260_vm0, %v781_v43 }
 0x209   : > { %v556_v44 = vpop.trf.xlu0 }
 0x20a   : > { %v593_v45 = vadd.f32 %v1410_v23, %v556_v44 }
 0x20b   : > { %v713_v46 = vpop.trf.xlu1 }
 0x20c   : > { %v745_v47 = vpop.trf.xlu2  ;;  %983 = vst.msk [vmem:[%s1408_s7 + $0x1c0] sm:$0xff] %vm260_vm0, %v593_v45  ;;  %v766_v48 = vadd.f32 %v1556_v58, %v713_v46 }
 0x20d   : > { %v782_v49 = vadd.f32 %v1556_v58, %v745_v47 }
 0x20e   : > { %1003 = vst.msk [vmem:[%s1408_s7 + $0x240] sm:$0xff] %vm260_vm0, %v766_v48 }
 0x20f   : > { %1019 = vst.msk [vmem:[%s1408_s7 + $0x2c0] sm:$0xff] %vm260_vm0, %v782_v49 }
 0x211   : > { %v557_v50 = vpop.trf.xlu0 }
 0x212   : > { %v594_v51 = vadd.f32 %v1410_v23, %v557_v50 }
 0x213   : > { %v714_v52 = vpop.trf.xlu1 }
 0x214   : > { %v746_v53 = vpop.trf.xlu2  ;;  %984 = vst.msk [vmem:[%s1408_s7 + $0x1c8] sm:$0xff] %vm260_vm0, %v594_v51  ;;  %v767_v54 = vadd.f32 %v1556_v58, %v714_v52 }
 0x215   : > { %v783_v55 = vadd.f32 %v1556_v58, %v746_v53 }
 0x216   : > { %1004 = vst.msk [vmem:[%s1408_s7 + $0x248] sm:$0xff] %vm260_vm0, %v767_v54 }
 0x217   : > { %1020 = vst.msk [vmem:[%s1408_s7 + $0x2c8] sm:$0xff] %vm260_vm0, %v783_v55 }
 0x219   : > { %v558_v56 = vpop.trf.xlu0 }
 0x21a   : > { %v595_v57 = vadd.f32 %v1410_v23, %v558_v56 }
 0x21b   : > { %v715_v59 = vpop.trf.xlu1 }
 0x21c   : > { %v747_v60 = vpop.trf.xlu2  ;;  %985 = vst.msk [vmem:[%s1408_s7 + $0x1d0] sm:$0xff] %vm260_vm0, %v595_v57  ;;  %v768_v61 = vadd.f32 %v1556_v58, %v715_v59 }
 0x21d   : > { %v784_v62 = vadd.f32 %v1556_v58, %v747_v60 }
 0x21e   : > { %1005 = vst.msk [vmem:[%s1408_s7 + $0x250] sm:$0xff] %vm260_vm0, %v768_v61 }
 0x21f   : > { %1021 = vst.msk [vmem:[%s1408_s7 + $0x2d0] sm:$0xff] %vm260_vm0, %v784_v62 }
 0x221   : > { %v559_v22 = vpop.trf.xlu0 }
 0x222   : > { %v596_v63 = vadd.f32 %v1410_v23, %v559_v22 }
 0x223   : > { %v716_v0 = vpop.trf.xlu1 }
 0x224   : > { %v748_v1 = vpop.trf.xlu2  ;;  %986 = vst.msk [vmem:[%s1408_s7 + $0x1d8] sm:$0xff] %vm260_vm0, %v596_v63  ;;  %v769_v2 = vadd.f32 %v1556_v58, %v716_v0 }
 0x225   : > { %v785_v3 = vadd.f32 %v1556_v58, %v748_v1 }
 0x226   : > { %1006 = vst.msk [vmem:[%s1408_s7 + $0x258] sm:$0xff] %vm260_vm0, %v769_v2 }
 0x227   : > { %1022 = vst.msk [vmem:[%s1408_s7 + $0x2d8] sm:$0xff] %vm260_vm0, %v785_v3 }
 0x229   : > { %v560_v4 = vpop.trf.xlu0 }
 0x22a   : > { %v597_v5 = vadd.f32 %v1410_v23, %v560_v4 }
 0x22b   : > { %v717_v6 = vpop.trf.xlu1 }
 0x22c   : > { %v749_v7 = vpop.trf.xlu2  ;;  %987 = vst.msk [vmem:[%s1408_s7 + $0x1e0] sm:$0xff] %vm260_vm0, %v597_v5  ;;  %v770_v8 = vadd.f32 %v1556_v58, %v717_v6 }
 0x22d   : > { %v786_v9 = vadd.f32 %v1556_v58, %v749_v7 }
 0x22e   : > { %1007 = vst.msk [vmem:[%s1408_s7 + $0x260] sm:$0xff] %vm260_vm0, %v770_v8 }
 0x22f   : > { %1023 = vst.msk [vmem:[%s1408_s7 + $0x2e0] sm:$0xff] %vm260_vm0, %v786_v9 }
 0x231   : > { %v561_v10 = vpop.trf.xlu0 }
 0x232   : > { %v598_v11 = vadd.f32 %v1410_v23, %v561_v10 }
 0x233   : > { %v718_v12 = vpop.trf.xlu1 }
 0x234   : > { %v750_v13 = vpop.trf.xlu2  ;;  %988 = vst.msk [vmem:[%s1408_s7 + $0x1e8] sm:$0xff] %vm260_vm0, %v598_v11  ;;  %v771_v14 = vadd.f32 %v1556_v58, %v718_v12 }
 0x235   : > { %v787_v15 = vadd.f32 %v1556_v58, %v750_v13 }
 0x236   : > { %1008 = vst.msk [vmem:[%s1408_s7 + $0x268] sm:$0xff] %vm260_vm0, %v771_v14 }
 0x237   : > { %1024 = vst.msk [vmem:[%s1408_s7 + $0x2e8] sm:$0xff] %vm260_vm0, %v787_v15 }
 0x239   : > { %v562_v16 = vpop.trf.xlu0 }
 0x23a   : > { %v599_v17 = vadd.f32 %v1410_v23, %v562_v16 }
 0x23b   : > { %v719_v18 = vpop.trf.xlu1 }
 0x23c   : > { %v751_v19 = vpop.trf.xlu2  ;;  %989 = vst.msk [vmem:[%s1408_s7 + $0x1f0] sm:$0xff] %vm260_vm0, %v599_v17  ;;  %v772_v20 = vadd.f32 %v1556_v58, %v719_v18 }
 0x23d   : > { %v788_v21 = vadd.f32 %v1556_v58, %v751_v19 }
 0x23e   : > { %1009 = vst.msk [vmem:[%s1408_s7 + $0x270] sm:$0xff] %vm260_vm0, %v772_v20 }
 0x23f   : > { %1025 = vst.msk [vmem:[%s1408_s7 + $0x2f0] sm:$0xff] %vm260_vm0, %v788_v21 }
 0x241   : > { %v563_v24 = vpop.trf.xlu0 }
 0x242   : > { %v600_v25 = vadd.f32 %v1410_v23, %v563_v24 }
 0x243   : > { %v720_v26 = vpop.trf.xlu1 }
 0x244   : > { %v752_v27 = vpop.trf.xlu2  ;;  %990 = vst.msk [vmem:[%s1408_s7 + $0x1f8] sm:$0xff] %vm260_vm0, %v600_v25  ;;  %v773_v28 = vadd.f32 %v1556_v58, %v720_v26 }
 0x245   : > { %v789_v29 = vadd.f32 %v1556_v58, %v752_v27 }
 0x246   : > { %1010 = vst.msk [vmem:[%s1408_s7 + $0x278] sm:$0xff] %vm260_vm0, %v773_v28 }
 0x247   : > { %1026 = vst.msk [vmem:[%s1408_s7 + $0x2f8] sm:$0xff] %vm260_vm0, %v789_v29 }
 0x248 PF: > { %s17_s17 = sadd.s32 1, %s1264_s17   ;;  %s1728_s12 = smov %s1248_s13 }
 0x249   : > { %p14_p2 = scmp.ge.s32.totalorder %s17_s17, 4   ;;  %s1729_s13 = smov %s1252_s14 }
 0x24a   : > { %s1730_s14 = smov %s1368_s23  ;;  %s1731_s15 = smov %s1260_s16 }
 0x24b   : > { %s1732_s16 = smov %s1734_s9  ;;  %16 = sbr.rel (!%p14_p2) target bundleno = 5 (0x5), region = 86 }
 0x250   :  { %853 = vsyncpa [#allocation3], 1 }
 0x251   :  { %855 = vsyncpa [#allocation3 + $0x1], 1 }
 0x252   :  { %856 = vsyncpa [#allocation5], 1 }

</bundles_post_ra>
